<compile_context>
chip_gen: v6e
topology: v6e:2x2x1
jax: 0.10.0
libtpu: 0.0.40
codegen_flags: <defaults>
</compile_context>

<pallas_src>
import math

import numpy as np

import jax
import jax.numpy as jnp
from jax import lax
from jax.experimental import pallas as pl
from jax.experimental.pallas import tpu as pltpu

D_EMB = 300          # embedding_dim hardcoded in the module
N_FILT = 150         # HDC filters
DILATIONS = (1, 2, 3)

C_PAD = 256          # 150 -> 256 lanes for lane-dense hidden/output tiles
LN_EPS = 1e-5        # PyTorch nn.LayerNorm default


# --------------------------------- kernel -----------------------------------

def _hdc_kernel(x_ref, m_ref, w1_ref, w2_ref, w3_ref, bp_ref,
                o1_ref, o2_ref, o3_ref):
    """One grid step: TB news items flattened to M = TB*L sublane rows.

    x_ref  : (M, 300)        bf16  item-major / position-minor rows
    m_ref  : (M, 8)          bf16  boundary masks [m1,p1,m2,p2,m3,p3,0,0]
    w?_ref : (3, Cin, C_PAD) bf16  tap weights [x[t-d], x[t], x[t+d]]
    bp_ref : (3, 3, C_PAD)   f32   [layer, {bias, gamma, beta}, channel]
    o?_ref : (M, C_PAD)      bf16  per-level output slabs
    """
    x = x_ref[...]              # (M, 300) bf16
    masks = m_ref[...]          # (M, 8)   bf16

    def conv_ln_relu(v, w_ref, d, layer):
        # v: (M, C) bf16 -> (M, C_PAD) bf16; padded lanes are exactly zero.
        M, C = v.shape
        zpad = jnp.zeros((d, C), v.dtype)
        mm = masks[:, 2 * layer:2 * layer + 1]        # valid t-d tap for this row
        mp = masks[:, 2 * layer + 1:2 * layer + 2]    # valid t+d tap for this row
        vm = jnp.concatenate([zpad, v[:M - d, :]], axis=0) * mm   # row t -> v[t-d]
        vp = jnp.concatenate([v[d:, :], zpad], axis=0) * mp       # row t -> v[t+d]

        # Three accumulated MXU dots instead of one wide-K concat matmul.
        y = jnp.dot(vm, w_ref[0], preferred_element_type=jnp.float32)
        y += jnp.dot(v, w_ref[1], preferred_element_type=jnp.float32)
        y += jnp.dot(vp, w_ref[2], preferred_element_type=jnp.float32)

        lp = bp_ref[layer]                              # (3, 256) f32
        y = y + lp[0:1, :]                              # conv bias
        # LayerNorm over the 150 real channels.  Padded lanes of y are exactly
        # zero (zero weight columns / bias), so 256-lane sums / N_FILT give
        # correct statistics; var is clamped at 0 before +eps.
        mu = jnp.sum(y, axis=-1, keepdims=True) * (1.0 / N_FILT)
        msq = jnp.sum(y * y, axis=-1, keepdims=True) * (1.0 / N_FILT)
        var = jnp.maximum(msq - mu * mu, 0.0)
        y = (y - mu) * lax.rsqrt(var + LN_EPS)
        y = y * lp[1:2, :] + lp[2:3, :]                 # gamma/beta (0 on pad lanes)
        return jnp.maximum(y, 0.0).astype(jnp.bfloat16)

    d1 = conv_ln_relu(x, w1_ref, DILATIONS[0], 0)
    d2 = conv_ln_relu(d1, w2_ref, DILATIONS[1], 1)
    d3 = conv_ln_relu(d2, w3_ref, DILATIONS[2], 2)

    o1_ref[...] = d1
    o2_ref[...] = d2
    o3_ref[...] = d3


# ------------------------------ pallas wrapper -------------------------------

def _choose_tb(batch, L, target_rows=1024):
    """Items per grid step: TB*L multiple of 8, ~target_rows rows, >=2 steps."""
    step = 8 // math.gcd(L, 8)                  # TB must be a multiple of this
    rnd = lambda n: -(-n // step) * step        # round up to a multiple of step
    tb = max(step, rnd(-(-target_rows // L)))   # ~target_rows rows per step
    tb = min(tb, max(step, rnd(-(-batch // 2))))  # keep >=2 grid steps (v7x 2 TCs)
    tb = min(tb, rnd(batch))                    # never exceed the padded batch
    return tb


def hdc_cnn_pallas(news_feat, w1p, w2p, w3p, bp):
    """news_feat: [B, L, 300] f32 -> stacked multi-level features [B, 3, L, 150]."""
    B, L, C = news_feat.shape
    TB = _choose_tb(B, L)
    B_pad = -(-B // TB) * TB
    M = TB * L

    x = jnp.pad(news_feat, ((0, B_pad - B), (0, 0), (0, 0)))
    x = x.reshape(B_pad * L, C).astype(jnp.bfloat16)      # bf16 activation DMA

    # Per-row boundary masks (identical every block -> VMEM resident).
    pos = np.tile(np.arange(L, dtype=np.int64), TB)
    mk = np.zeros((M, 8), np.float32)
    for di, d in enumerate(DILATIONS):
        mk[:, 2 * di] = (pos >= d)
        mk[:, 2 * di + 1] = (pos < L - d)
    masks = jnp.asarray(mk, dtype=jnp.bfloat16)

    out_sds = jax.ShapeDtypeStruct((B_pad * L, C_PAD), jnp.bfloat16)
    o1, o2, o3 = pl.pallas_call(
        _hdc_kernel,
        out_shape=(out_sds, out_sds, out_sds),
        grid=(B_pad // TB,),
        in_specs=[
            pl.BlockSpec((M, C), lambda i: (i, 0)),
            pl.BlockSpec((M, 8), lambda i: (0, 0)),
            pl.BlockSpec((3, D_EMB, C_PAD), lambda i: (0, 0, 0)),
            pl.BlockSpec((3, C_PAD, C_PAD), lambda i: (0, 0, 0)),
            pl.BlockSpec((3, C_PAD, C_PAD), lambda i: (0, 0, 0)),
            pl.BlockSpec((3, 3, C_PAD), lambda i: (0, 0, 0)),
        ],
        out_specs=(
            pl.BlockSpec((M, C_PAD), lambda i: (i, 0)),
            pl.BlockSpec((M, C_PAD), lambda i: (i, 0)),
            pl.BlockSpec((M, C_PAD), lambda i: (i, 0)),
        ),
        compiler_params=pltpu.CompilerParams(
            dimension_semantics=("parallel",),
            vmem_limit_bytes=48 << 20),
    )(x, masks, w1p, w2p, w3p, bp)

    def fin(o):
        return o.reshape(B_pad, L, C_PAD)[:B, :, :N_FILT]

    out = jnp.stack([fin(o1), fin(o2), fin(o3)], axis=1)   # [B, 3, L, 150] bf16
    return out.astype(jnp.float32)


def pack_params(params):
    """Pack conv weights [3, Cin, Cout] + LN params into the kernel layout.

    NOTE: PyTorch Conv1d weights are [Cout, Cin, K]; to load pretrained FIM
    weights convert with w.permute(2, 1, 0) before feeding them here.
    """
    def pack_w(w, cin_pad):
        k, cin, cout = w.shape
        wp = jnp.zeros((k, cin_pad, C_PAD), jnp.float32).at[:, :cin, :cout].set(w)
        return wp.astype(jnp.bfloat16)

    def pack_lnb(b, g, be):
        p = jnp.zeros((3, C_PAD), jnp.float32)
        p = p.at[0, :N_FILT].set(b.reshape(-1))
        p = p.at[1, :N_FILT].set(g.reshape(-1))
        p = p.at[2, :N_FILT].set(be.reshape(-1))
        return p

    w1p = pack_w(params["w1"], D_EMB)      # (3, 300, 256) — no input-lane padding
    w2p = pack_w(params["w2"], C_PAD)      # (3, 256, 256)
    w3p = pack_w(params["w3"], C_PAD)
    bp = jnp.stack([
        pack_lnb(params["b1"], params["g1"], params["beta1"]),
        pack_lnb(params["b2"], params["g2"], params["beta2"]),
        pack_lnb(params["b3"], params["g3"], params["beta3"]),
    ], axis=0)
    return w1p, w2p, w3p, bp


# ------------------------------ module in JAX --------------------------------

def init_params(key, title_word_size, category_size, subcategory_size):
    del title_word_size  # only affects activation shapes
    ks = jax.random.split(key, 8)
    scale_in = 1.0 / jnp.sqrt(3.0 * D_EMB)
    scale_h = 1.0 / jnp.sqrt(3.0 * N_FILT)
    return {
        "cat_table": 0.1 * jax.random.normal(ks[0], (category_size, D_EMB), jnp.float32),
        "subcat_table": 0.1 * jax.random.normal(ks[1], (subcategory_size, D_EMB), jnp.float32),
        "w1": scale_in * jax.random.normal(ks[2], (3, D_EMB, N_FILT), jnp.float32),
        "w2": scale_h * jax.random.normal(ks[3], (3, N_FILT, N_FILT), jnp.float32),
        "w3": scale_h * jax.random.normal(ks[4], (3, N_FILT, N_FILT), jnp.float32),
        "b1": jnp.zeros((1, N_FILT), jnp.float32),
        "b2": jnp.zeros((1, N_FILT), jnp.float32),
        "b3": jnp.zeros((1, N_FILT), jnp.float32),
        "g1": jnp.ones((1, N_FILT), jnp.float32),
        "g2": jnp.ones((1, N_FILT), jnp.float32),
        "g3": jnp.ones((1, N_FILT), jnp.float32),
        "beta1": jnp.zeros((1, N_FILT), jnp.float32),
        "beta2": jnp.zeros((1, N_FILT), jnp.float32),
        "beta3": jnp.zeros((1, N_FILT), jnp.float32),
    }


def new_encoder_forward(params, word_embedding, category_index, subcategory_index):
    # Embedding lookups + unsqueeze(1) + concat along the word axis (glue in JAX).
    cat_emb = params["cat_table"][category_index.astype(jnp.int32)][:, None, :]
    subcat_emb = params["subcat_table"][subcategory_index.astype(jnp.int32)][:, None, :]
    news_feat = jnp.concatenate([word_embedding, cat_emb, subcat_emb], axis=1)  # [B, L, 300]
    w1p, w2p, w3p, bp = pack_params(params)
    return hdc_cnn_pallas(news_feat, w1p, w2p, w3p, bp)          # [B, 3, L, 150]


def user_encoder_forward(params, word_embedding, category_index, subcategory_index):
    news_vec = new_encoder_forward(params, word_embedding, category_index, subcategory_index)
    return news_vec[None]                                        # unsqueeze(0) -> [1, B, 3, L, 150]


# --------------------------- pure-JAX reference ------------------------------

def _hdc_cnn_reference(params, news_feat):
    """Pure-JAX mirror of the kernel math (bf16 matmul operands, f32 LayerNorm)."""
    def layer(v, w, b, g, be, d):
        B, L, C = v.shape
        z = jnp.zeros((B, d, C), v.dtype)
        vm = jnp.concatenate([z, v[:, :L - d, :]], axis=1)
        vp = jnp.concatenate([v[:, d:, :], z], axis=1)
        x3 = jnp.concatenate([vm, v, vp], axis=-1).astype(jnp.bfloat16)
        wk = w.reshape(3 * C, -1).astype(jnp.bfloat16)
        y = jnp.dot(x3.reshape(B * L, 3 * C), wk,
                    preferred_element_type=jnp.float32).reshape(B, L, -1)
        y = y + b.reshape(1, 1, -1)
        mu = jnp.mean(y, axis=-1, keepdims=True)
        var = jnp.mean(y * y, axis=-1, keepdims=True) - mu * mu
        y = (y - mu) * lax.rsqrt(var + LN_EPS)
        y = y * g.reshape(1, 1, -1) + be.reshape(1, 1, -1)
        return jnp.maximum(y, 0.0)

    d1 = layer(news_feat, params["w1"], params["b1"], params["g1"], params["beta1"], 1)
    d2 = layer(d1, params["w2"], params["b2"], params["g2"], params["beta2"], 2)
    d3 = layer(d2, params["w3"], params["b3"], params["g3"], params["beta3"], 3)
    return jnp.stack([d1, d2, d3], axis=1)                        # [B, 3, L, 150]


# ---------------------------------- main -------------------------------------

if __name__ == "__main__":
    B = 2                    # number of clicked news items
    title_word_size = 10     # -> news_feature_size L = 12
    category_size = 7
    subcategory_size = 9
    L = title_word_size + 2

    key = jax.random.PRNGKey(0)
    k_param, k_word, k_cat, k_sub = jax.random.split(key, 4)

    params = init_params(k_param, title_word_size, category_size, subcategory_size)

    word_embedding = jax.random.normal(k_word, (B, title_word_size, D_EMB), jnp.float32)
    category_index = jax.random.randint(k_cat, (B,), 0, category_size, jnp.int32)
    subcategory_index = jax.random.randint(k_sub, (B,), 0, subcategory_size, jnp.int32)

    fwd = jax.jit(user_encoder_forward)
    user_rep = jax.block_until_ready(
        fwd(params, word_embedding, category_index, subcategory_index))

    assert user_rep.shape == (1, B, 3, L, N_FILT), user_rep.shape
    assert bool(jnp.all(jnp.isfinite(user_rep)))

    # Numerics check against the pure-JAX reference of the same math (the
    # kernel stores bf16 outputs, so quantize the reference the same way).
    cat_emb = params["cat_table"][category_index][:, None, :]
    subcat_emb = params["subcat_table"][subcategory_index][:, None, :]
    news_feat = jnp.concatenate([word_embedding, cat_emb, subcat_emb], axis=1)
    ref = _hdc_cnn_reference(params, news_feat)
    ref = ref.astype(jnp.bfloat16).astype(jnp.float32)
    max_err = float(jnp.max(jnp.abs(user_rep[0] - ref)))
    assert max_err < 2e-2, f"kernel/reference mismatch: {max_err}"

    print("KERNEL_OK")
</pallas_src>

<mosaic_0001>
module attributes {stable_mosaic.version = 11 : i64} {
  func.func @_hdc_kernel(%arg0: i32, %arg1: memref<24x300xbf16, #tpu.memory_space<vmem>>, %arg2: memref<24x8xbf16, #tpu.memory_space<vmem>>, %arg3: memref<3x300x256xbf16, #tpu.memory_space<vmem>>, %arg4: memref<3x256x256xbf16, #tpu.memory_space<vmem>>, %arg5: memref<3x256x256xbf16, #tpu.memory_space<vmem>>, %arg6: memref<3x3x256xf32, #tpu.memory_space<vmem>>, %arg7: memref<24x256xbf16, #tpu.memory_space<vmem>>, %arg8: memref<24x256xbf16, #tpu.memory_space<vmem>>, %arg9: memref<24x256xbf16, #tpu.memory_space<vmem>>) attributes {dimension_semantics = [#tpu.dimension_semantics<parallel>], iteration_bounds = array<i64: 1>, scalar_prefetch = 0 : i64, scratch_operands = 0 : i64, tpu.core_type = #tpu.core_type<tc>, window_params = [{transform_indices = @transform_0, window_bounds = array<i64: 24, 300>}, {pipeline_mode = #tpu.pipeline_mode<synchronous>, transform_indices = @transform_1, window_bounds = array<i64: 24, 8>}, {pipeline_mode = #tpu.pipeline_mode<synchronous>, transform_indices = @transform_2, window_bounds = array<i64: 3, 300, 256>}, {pipeline_mode = #tpu.pipeline_mode<synchronous>, transform_indices = @transform_3, window_bounds = array<i64: 3, 256, 256>}, {pipeline_mode = #tpu.pipeline_mode<synchronous>, transform_indices = @transform_4, window_bounds = array<i64: 3, 256, 256>}, {pipeline_mode = #tpu.pipeline_mode<synchronous>, transform_indices = @transform_5, window_bounds = array<i64: 3, 3, 256>}, {transform_indices = @transform_6, window_bounds = array<i64: 24, 256>}, {transform_indices = @transform_7, window_bounds = array<i64: 24, 256>}, {transform_indices = @transform_8, window_bounds = array<i64: 24, 256>}]} {
    %c0 = arith.constant 0 : index
    %c0_0 = arith.constant 0 : index
    %0 = vector.load %arg1[%c0, %c0_0] : memref<24x300xbf16, #tpu.memory_space<vmem>>, vector<24x300xbf16>
    %c0_1 = arith.constant 0 : index
    %c0_2 = arith.constant 0 : index
    %1 = vector.load %arg2[%c0_1, %c0_2] : memref<24x8xbf16, #tpu.memory_space<vmem>>, vector<24x8xbf16>
    %cst = arith.constant 0.000000e+00 : bf16
    %2 = vector.broadcast %cst : bf16 to vector<1x300xbf16>
    %3 = vector.extract_strided_slice %1 {offsets = [0, 0], sizes = [24, 1], strides = [1, 1]} : vector<24x8xbf16> to vector<24x1xbf16>
    %4 = vector.extract_strided_slice %1 {offsets = [0, 1], sizes = [24, 1], strides = [1, 1]} : vector<24x8xbf16> to vector<24x1xbf16>
    %5 = vector.extract_strided_slice %0 {offsets = [0, 0], sizes = [23, 300], strides = [1, 1]} : vector<24x300xbf16> to vector<23x300xbf16>
    %6 = tpu.concatenate %2, %5 in 0 : vector<1x300xbf16>, vector<23x300xbf16> -> vector<24x300xbf16>
    %7 = vector.broadcast %3 : vector<24x1xbf16> to vector<24x300xbf16>
    %8 = arith.mulf %6, %7 : vector<24x300xbf16>
    %9 = vector.extract_strided_slice %0 {offsets = [1, 0], sizes = [23, 300], strides = [1, 1]} : vector<24x300xbf16> to vector<23x300xbf16>
    %10 = tpu.concatenate %9, %2 in 0 : vector<23x300xbf16>, vector<1x300xbf16> -> vector<24x300xbf16>
    %11 = vector.broadcast %4 : vector<24x1xbf16> to vector<24x300xbf16>
    %12 = arith.mulf %10, %11 : vector<24x300xbf16>
    %c0_3 = arith.constant 0 : index
    %c0_4 = arith.constant 0 : index
    %c0_5 = arith.constant 0 : index
    %13 = vector.load %arg3[%c0_3, %c0_4, %c0_5] : memref<3x300x256xbf16, #tpu.memory_space<vmem>>, vector<1x300x256xbf16>
    %14 = vector.shape_cast %13 : vector<1x300x256xbf16> to vector<300x256xbf16>
    %cst_6 = arith.constant dense<0.000000e+00> : vector<24x256xf32>
    %15 = tpu.matmul %8, %14, %cst_6 {dimension_numbers = #tpu.dot_dimension_numbers<[1], [0], [0], [1], [0, 0, 1, 1], [], []>} : vector<24x300xbf16>, vector<300x256xbf16>, vector<24x256xf32> -> vector<24x256xf32>
    %c1 = arith.constant 1 : index
    %c0_7 = arith.constant 0 : index
    %c0_8 = arith.constant 0 : index
    %16 = vector.load %arg3[%c1, %c0_7, %c0_8] : memref<3x300x256xbf16, #tpu.memory_space<vmem>>, vector<1x300x256xbf16>
    %17 = vector.shape_cast %16 : vector<1x300x256xbf16> to vector<300x256xbf16>
    %cst_9 = arith.constant dense<0.000000e+00> : vector<24x256xf32>
    %18 = tpu.matmul %0, %17, %cst_9 {dimension_numbers = #tpu.dot_dimension_numbers<[1], [0], [0], [1], [0, 0, 1, 1], [], []>} : vector<24x300xbf16>, vector<300x256xbf16>, vector<24x256xf32> -> vector<24x256xf32>
    %19 = arith.addf %15, %18 : vector<24x256xf32>
    %c2 = arith.constant 2 : index
    %c0_10 = arith.constant 0 : index
    %c0_11 = arith.constant 0 : index
    %20 = vector.load %arg3[%c2, %c0_10, %c0_11] : memref<3x300x256xbf16, #tpu.memory_space<vmem>>, vector<1x300x256xbf16>
    %21 = vector.shape_cast %20 : vector<1x300x256xbf16> to vector<300x256xbf16>
    %cst_12 = arith.constant dense<0.000000e+00> : vector<24x256xf32>
    %22 = tpu.matmul %12, %21, %cst_12 {dimension_numbers = #tpu.dot_dimension_numbers<[1], [0], [0], [1], [0, 0, 1, 1], [], []>} : vector<24x300xbf16>, vector<300x256xbf16>, vector<24x256xf32> -> vector<24x256xf32>
    %23 = arith.addf %19, %22 : vector<24x256xf32>
    %c0_13 = arith.constant 0 : index
    %c0_14 = arith.constant 0 : index
    %c0_15 = arith.constant 0 : index
    %24 = vector.load %arg6[%c0_13, %c0_14, %c0_15] : memref<3x3x256xf32, #tpu.memory_space<vmem>>, vector<1x3x256xf32>
    %25 = vector.shape_cast %24 : vector<1x3x256xf32> to vector<3x256xf32>
    %26 = vector.extract_strided_slice %25 {offsets = [0, 0], sizes = [1, 256], strides = [1, 1]} : vector<3x256xf32> to vector<1x256xf32>
    %27 = vector.broadcast %26 : vector<1x256xf32> to vector<24x256xf32>
    %28 = arith.addf %23, %27 : vector<24x256xf32>
    %cst_16 = arith.constant dense<0.000000e+00> : vector<24xf32>
    %29 = vector.multi_reduction <add>, %28, %cst_16 [1] : vector<24x256xf32> to vector<24xf32>
    %30 = vector.shape_cast %29 : vector<24xf32> to vector<24x1xf32>
    %cst_17 = arith.constant 0.00666666683 : f32
    %31 = vector.broadcast %cst_17 : f32 to vector<24x1xf32>
    %32 = arith.mulf %30, %31 : vector<24x1xf32>
    %33 = arith.mulf %28, %28 : vector<24x256xf32>
    %cst_18 = arith.constant dense<0.000000e+00> : vector<24xf32>
    %34 = vector.multi_reduction <add>, %33, %cst_18 [1] : vector<24x256xf32> to vector<24xf32>
    %35 = vector.shape_cast %34 : vector<24xf32> to vector<24x1xf32>
    %cst_19 = arith.constant 0.00666666683 : f32
    %36 = vector.broadcast %cst_19 : f32 to vector<24x1xf32>
    %37 = arith.mulf %35, %36 : vector<24x1xf32>
    %38 = arith.mulf %32, %32 : vector<24x1xf32>
    %39 = arith.subf %37, %38 : vector<24x1xf32>
    %cst_20 = arith.constant 0.000000e+00 : f32
    %40 = vector.broadcast %cst_20 : f32 to vector<24x1xf32>
    %41 = arith.maximumf %39, %40 : vector<24x1xf32>
    %42 = vector.broadcast %32 : vector<24x1xf32> to vector<24x256xf32>
    %43 = arith.subf %28, %42 : vector<24x256xf32>
    %cst_21 = arith.constant 9.99999974E-6 : f32
    %44 = vector.broadcast %cst_21 : f32 to vector<24x1xf32>
    %45 = arith.addf %41, %44 : vector<24x1xf32>
    %46 = math.rsqrt %45 : vector<24x1xf32>
    %47 = vector.broadcast %46 : vector<24x1xf32> to vector<24x256xf32>
    %48 = arith.mulf %43, %47 : vector<24x256xf32>
    %49 = vector.extract_strided_slice %25 {offsets = [1, 0], sizes = [1, 256], strides = [1, 1]} : vector<3x256xf32> to vector<1x256xf32>
    %50 = vector.broadcast %49 : vector<1x256xf32> to vector<24x256xf32>
    %51 = arith.mulf %48, %50 : vector<24x256xf32>
    %52 = vector.extract_strided_slice %25 {offsets = [2, 0], sizes = [1, 256], strides = [1, 1]} : vector<3x256xf32> to vector<1x256xf32>
    %53 = vector.broadcast %52 : vector<1x256xf32> to vector<24x256xf32>
    %54 = arith.addf %51, %53 : vector<24x256xf32>
    %cst_22 = arith.constant 0.000000e+00 : f32
    %55 = vector.broadcast %cst_22 : f32 to vector<24x256xf32>
    %56 = arith.maximumf %54, %55 : vector<24x256xf32>
    %57 = arith.truncf %56 : vector<24x256xf32> to vector<24x256xbf16>
    %cst_23 = arith.constant 0.000000e+00 : bf16
    %58 = vector.broadcast %cst_23 : bf16 to vector<2x256xbf16>
    %59 = vector.extract_strided_slice %1 {offsets = [0, 2], sizes = [24, 1], strides = [1, 1]} : vector<24x8xbf16> to vector<24x1xbf16>
    %60 = vector.extract_strided_slice %1 {offsets = [0, 3], sizes = [24, 1], strides = [1, 1]} : vector<24x8xbf16> to vector<24x1xbf16>
    %61 = vector.extract_strided_slice %57 {offsets = [0, 0], sizes = [22, 256], strides = [1, 1]} : vector<24x256xbf16> to vector<22x256xbf16>
    %62 = tpu.concatenate %58, %61 in 0 : vector<2x256xbf16>, vector<22x256xbf16> -> vector<24x256xbf16>
    %63 = vector.broadcast %59 : vector<24x1xbf16> to vector<24x256xbf16>
    %64 = arith.mulf %62, %63 : vector<24x256xbf16>
    %65 = vector.extract_strided_slice %57 {offsets = [2, 0], sizes = [22, 256], strides = [1, 1]} : vector<24x256xbf16> to vector<22x256xbf16>
    %66 = tpu.concatenate %65, %58 in 0 : vector<22x256xbf16>, vector<2x256xbf16> -> vector<24x256xbf16>
    %67 = vector.broadcast %60 : vector<24x1xbf16> to vector<24x256xbf16>
    %68 = arith.mulf %66, %67 : vector<24x256xbf16>
    %c0_24 = arith.constant 0 : index
    %c0_25 = arith.constant 0 : index
    %c0_26 = arith.constant 0 : index
    %69 = vector.load %arg4[%c0_24, %c0_25, %c0_26] : memref<3x256x256xbf16, #tpu.memory_space<vmem>>, vector<1x256x256xbf16>
    %70 = vector.shape_cast %69 : vector<1x256x256xbf16> to vector<256x256xbf16>
    %cst_27 = arith.constant dense<0.000000e+00> : vector<24x256xf32>
    %71 = tpu.matmul %64, %70, %cst_27 {dimension_numbers = #tpu.dot_dimension_numbers<[1], [0], [0], [1], [0, 0, 1, 1], [], []>} : vector<24x256xbf16>, vector<256x256xbf16>, vector<24x256xf32> -> vector<24x256xf32>
    %c1_28 = arith.constant 1 : index
    %c0_29 = arith.constant 0 : index
    %c0_30 = arith.constant 0 : index
    %72 = vector.load %arg4[%c1_28, %c0_29, %c0_30] : memref<3x256x256xbf16, #tpu.memory_space<vmem>>, vector<1x256x256xbf16>
    %73 = vector.shape_cast %72 : vector<1x256x256xbf16> to vector<256x256xbf16>
    %cst_31 = arith.constant dense<0.000000e+00> : vector<24x256xf32>
    %74 = tpu.matmul %57, %73, %cst_31 {dimension_numbers = #tpu.dot_dimension_numbers<[1], [0], [0], [1], [0, 0, 1, 1], [], []>} : vector<24x256xbf16>, vector<256x256xbf16>, vector<24x256xf32> -> vector<24x256xf32>
    %75 = arith.addf %71, %74 : vector<24x256xf32>
    %c2_32 = arith.constant 2 : index
    %c0_33 = arith.constant 0 : index
    %c0_34 = arith.constant 0 : index
    %76 = vector.load %arg4[%c2_32, %c0_33, %c0_34] : memref<3x256x256xbf16, #tpu.memory_space<vmem>>, vector<1x256x256xbf16>
    %77 = vector.shape_cast %76 : vector<1x256x256xbf16> to vector<256x256xbf16>
    %cst_35 = arith.constant dense<0.000000e+00> : vector<24x256xf32>
    %78 = tpu.matmul %68, %77, %cst_35 {dimension_numbers = #tpu.dot_dimension_numbers<[1], [0], [0], [1], [0, 0, 1, 1], [], []>} : vector<24x256xbf16>, vector<256x256xbf16>, vector<24x256xf32> -> vector<24x256xf32>
    %79 = arith.addf %75, %78 : vector<24x256xf32>
    %c1_36 = arith.constant 1 : index
    %c0_37 = arith.constant 0 : index
    %c0_38 = arith.constant 0 : index
    %80 = vector.load %arg6[%c1_36, %c0_37, %c0_38] : memref<3x3x256xf32, #tpu.memory_space<vmem>>, vector<1x3x256xf32>
    %81 = vector.shape_cast %80 : vector<1x3x256xf32> to vector<3x256xf32>
    %82 = vector.extract_strided_slice %81 {offsets = [0, 0], sizes = [1, 256], strides = [1, 1]} : vector<3x256xf32> to vector<1x256xf32>
    %83 = vector.broadcast %82 : vector<1x256xf32> to vector<24x256xf32>
    %84 = arith.addf %79, %83 : vector<24x256xf32>
    %cst_39 = arith.constant dense<0.000000e+00> : vector<24xf32>
    %85 = vector.multi_reduction <add>, %84, %cst_39 [1] : vector<24x256xf32> to vector<24xf32>
    %86 = vector.shape_cast %85 : vector<24xf32> to vector<24x1xf32>
    %cst_40 = arith.constant 0.00666666683 : f32
    %87 = vector.broadcast %cst_40 : f32 to vector<24x1xf32>
    %88 = arith.mulf %86, %87 : vector<24x1xf32>
    %89 = arith.mulf %84, %84 : vector<24x256xf32>
    %cst_41 = arith.constant dense<0.000000e+00> : vector<24xf32>
    %90 = vector.multi_reduction <add>, %89, %cst_41 [1] : vector<24x256xf32> to vector<24xf32>
    %91 = vector.shape_cast %90 : vector<24xf32> to vector<24x1xf32>
    %cst_42 = arith.constant 0.00666666683 : f32
    %92 = vector.broadcast %cst_42 : f32 to vector<24x1xf32>
    %93 = arith.mulf %91, %92 : vector<24x1xf32>
    %94 = arith.mulf %88, %88 : vector<24x1xf32>
    %95 = arith.subf %93, %94 : vector<24x1xf32>
    %cst_43 = arith.constant 0.000000e+00 : f32
    %96 = vector.broadcast %cst_43 : f32 to vector<24x1xf32>
    %97 = arith.maximumf %95, %96 : vector<24x1xf32>
    %98 = vector.broadcast %88 : vector<24x1xf32> to vector<24x256xf32>
    %99 = arith.subf %84, %98 : vector<24x256xf32>
    %cst_44 = arith.constant 9.99999974E-6 : f32
    %100 = vector.broadcast %cst_44 : f32 to vector<24x1xf32>
    %101 = arith.addf %97, %100 : vector<24x1xf32>
    %102 = math.rsqrt %101 : vector<24x1xf32>
    %103 = vector.broadcast %102 : vector<24x1xf32> to vector<24x256xf32>
    %104 = arith.mulf %99, %103 : vector<24x256xf32>
    %105 = vector.extract_strided_slice %81 {offsets = [1, 0], sizes = [1, 256], strides = [1, 1]} : vector<3x256xf32> to vector<1x256xf32>
    %106 = vector.broadcast %105 : vector<1x256xf32> to vector<24x256xf32>
    %107 = arith.mulf %104, %106 : vector<24x256xf32>
    %108 = vector.extract_strided_slice %81 {offsets = [2, 0], sizes = [1, 256], strides = [1, 1]} : vector<3x256xf32> to vector<1x256xf32>
    %109 = vector.broadcast %108 : vector<1x256xf32> to vector<24x256xf32>
    %110 = arith.addf %107, %109 : vector<24x256xf32>
    %cst_45 = arith.constant 0.000000e+00 : f32
    %111 = vector.broadcast %cst_45 : f32 to vector<24x256xf32>
    %112 = arith.maximumf %110, %111 : vector<24x256xf32>
    %113 = arith.truncf %112 : vector<24x256xf32> to vector<24x256xbf16>
    %cst_46 = arith.constant 0.000000e+00 : bf16
    %114 = vector.broadcast %cst_46 : bf16 to vector<3x256xbf16>
    %115 = vector.extract_strided_slice %1 {offsets = [0, 4], sizes = [24, 1], strides = [1, 1]} : vector<24x8xbf16> to vector<24x1xbf16>
    %116 = vector.extract_strided_slice %1 {offsets = [0, 5], sizes = [24, 1], strides = [1, 1]} : vector<24x8xbf16> to vector<24x1xbf16>
    %117 = vector.extract_strided_slice %113 {offsets = [0, 0], sizes = [21, 256], strides = [1, 1]} : vector<24x256xbf16> to vector<21x256xbf16>
    %118 = tpu.concatenate %114, %117 in 0 : vector<3x256xbf16>, vector<21x256xbf16> -> vector<24x256xbf16>
    %119 = vector.broadcast %115 : vector<24x1xbf16> to vector<24x256xbf16>
    %120 = arith.mulf %118, %119 : vector<24x256xbf16>
    %121 = vector.extract_strided_slice %113 {offsets = [3, 0], sizes = [21, 256], strides = [1, 1]} : vector<24x256xbf16> to vector<21x256xbf16>
    %122 = tpu.concatenate %121, %114 in 0 : vector<21x256xbf16>, vector<3x256xbf16> -> vector<24x256xbf16>
    %123 = vector.broadcast %116 : vector<24x1xbf16> to vector<24x256xbf16>
    %124 = arith.mulf %122, %123 : vector<24x256xbf16>
    %c0_47 = arith.constant 0 : index
    %c0_48 = arith.constant 0 : index
    %c0_49 = arith.constant 0 : index
    %125 = vector.load %arg5[%c0_47, %c0_48, %c0_49] : memref<3x256x256xbf16, #tpu.memory_space<vmem>>, vector<1x256x256xbf16>
    %126 = vector.shape_cast %125 : vector<1x256x256xbf16> to vector<256x256xbf16>
    %cst_50 = arith.constant dense<0.000000e+00> : vector<24x256xf32>
    %127 = tpu.matmul %120, %126, %cst_50 {dimension_numbers = #tpu.dot_dimension_numbers<[1], [0], [0], [1], [0, 0, 1, 1], [], []>} : vector<24x256xbf16>, vector<256x256xbf16>, vector<24x256xf32> -> vector<24x256xf32>
    %c1_51 = arith.constant 1 : index
    %c0_52 = arith.constant 0 : index
    %c0_53 = arith.constant 0 : index
    %128 = vector.load %arg5[%c1_51, %c0_52, %c0_53] : memref<3x256x256xbf16, #tpu.memory_space<vmem>>, vector<1x256x256xbf16>
    %129 = vector.shape_cast %128 : vector<1x256x256xbf16> to vector<256x256xbf16>
    %cst_54 = arith.constant dense<0.000000e+00> : vector<24x256xf32>
    %130 = tpu.matmul %113, %129, %cst_54 {dimension_numbers = #tpu.dot_dimension_numbers<[1], [0], [0], [1], [0, 0, 1, 1], [], []>} : vector<24x256xbf16>, vector<256x256xbf16>, vector<24x256xf32> -> vector<24x256xf32>
    %131 = arith.addf %127, %130 : vector<24x256xf32>
    %c2_55 = arith.constant 2 : index
    %c0_56 = arith.constant 0 : index
    %c0_57 = arith.constant 0 : index
    %132 = vector.load %arg5[%c2_55, %c0_56, %c0_57] : memref<3x256x256xbf16, #tpu.memory_space<vmem>>, vector<1x256x256xbf16>
    %133 = vector.shape_cast %132 : vector<1x256x256xbf16> to vector<256x256xbf16>
    %cst_58 = arith.constant dense<0.000000e+00> : vector<24x256xf32>
    %134 = tpu.matmul %124, %133, %cst_58 {dimension_numbers = #tpu.dot_dimension_numbers<[1], [0], [0], [1], [0, 0, 1, 1], [], []>} : vector<24x256xbf16>, vector<256x256xbf16>, vector<24x256xf32> -> vector<24x256xf32>
    %135 = arith.addf %131, %134 : vector<24x256xf32>
    %c2_59 = arith.constant 2 : index
    %c0_60 = arith.constant 0 : index
    %c0_61 = arith.constant 0 : index
    %136 = vector.load %arg6[%c2_59, %c0_60, %c0_61] : memref<3x3x256xf32, #tpu.memory_space<vmem>>, vector<1x3x256xf32>
    %137 = vector.shape_cast %136 : vector<1x3x256xf32> to vector<3x256xf32>
    %138 = vector.extract_strided_slice %137 {offsets = [0, 0], sizes = [1, 256], strides = [1, 1]} : vector<3x256xf32> to vector<1x256xf32>
    %139 = vector.broadcast %138 : vector<1x256xf32> to vector<24x256xf32>
    %140 = arith.addf %135, %139 : vector<24x256xf32>
    %cst_62 = arith.constant dense<0.000000e+00> : vector<24xf32>
    %141 = vector.multi_reduction <add>, %140, %cst_62 [1] : vector<24x256xf32> to vector<24xf32>
    %142 = vector.shape_cast %141 : vector<24xf32> to vector<24x1xf32>
    %cst_63 = arith.constant 0.00666666683 : f32
    %143 = vector.broadcast %cst_63 : f32 to vector<24x1xf32>
    %144 = arith.mulf %142, %143 : vector<24x1xf32>
    %145 = arith.mulf %140, %140 : vector<24x256xf32>
    %cst_64 = arith.constant dense<0.000000e+00> : vector<24xf32>
    %146 = vector.multi_reduction <add>, %145, %cst_64 [1] : vector<24x256xf32> to vector<24xf32>
    %147 = vector.shape_cast %146 : vector<24xf32> to vector<24x1xf32>
    %cst_65 = arith.constant 0.00666666683 : f32
    %148 = vector.broadcast %cst_65 : f32 to vector<24x1xf32>
    %149 = arith.mulf %147, %148 : vector<24x1xf32>
    %150 = arith.mulf %144, %144 : vector<24x1xf32>
    %151 = arith.subf %149, %150 : vector<24x1xf32>
    %cst_66 = arith.constant 0.000000e+00 : f32
    %152 = vector.broadcast %cst_66 : f32 to vector<24x1xf32>
    %153 = arith.maximumf %151, %152 : vector<24x1xf32>
    %154 = vector.broadcast %144 : vector<24x1xf32> to vector<24x256xf32>
    %155 = arith.subf %140, %154 : vector<24x256xf32>
    %cst_67 = arith.constant 9.99999974E-6 : f32
    %156 = vector.broadcast %cst_67 : f32 to vector<24x1xf32>
    %157 = arith.addf %153, %156 : vector<24x1xf32>
    %158 = math.rsqrt %157 : vector<24x1xf32>
    %159 = vector.broadcast %158 : vector<24x1xf32> to vector<24x256xf32>
    %160 = arith.mulf %155, %159 : vector<24x256xf32>
    %161 = vector.extract_strided_slice %137 {offsets = [1, 0], sizes = [1, 256], strides = [1, 1]} : vector<3x256xf32> to vector<1x256xf32>
    %162 = vector.broadcast %161 : vector<1x256xf32> to vector<24x256xf32>
    %163 = arith.mulf %160, %162 : vector<24x256xf32>
    %164 = vector.extract_strided_slice %137 {offsets = [2, 0], sizes = [1, 256], strides = [1, 1]} : vector<3x256xf32> to vector<1x256xf32>
    %165 = vector.broadcast %164 : vector<1x256xf32> to vector<24x256xf32>
    %166 = arith.addf %163, %165 : vector<24x256xf32>
    %cst_68 = arith.constant 0.000000e+00 : f32
    %167 = vector.broadcast %cst_68 : f32 to vector<24x256xf32>
    %168 = arith.maximumf %166, %167 : vector<24x256xf32>
    %169 = arith.truncf %168 : vector<24x256xf32> to vector<24x256xbf16>
    %c0_69 = arith.constant 0 : index
    %c0_70 = arith.constant 0 : index
    %170 = vector.load %arg7[%c0_69, %c0_70] : memref<24x256xbf16, #tpu.memory_space<vmem>>, vector<24x256xbf16>
    tpu.vector_store %arg7[%c0_69, %c0_70], %57 {strides = array<i32>} : memref<24x256xbf16, #tpu.memory_space<vmem>>, vector<24x256xbf16>,
    %c0_71 = arith.constant 0 : index
    %c0_72 = arith.constant 0 : index
    %171 = vector.load %arg8[%c0_71, %c0_72] : memref<24x256xbf16, #tpu.memory_space<vmem>>, vector<24x256xbf16>
    tpu.vector_store %arg8[%c0_71, %c0_72], %113 {strides = array<i32>} : memref<24x256xbf16, #tpu.memory_space<vmem>>, vector<24x256xbf16>,
    %c0_73 = arith.constant 0 : index
    %c0_74 = arith.constant 0 : index
    %172 = vector.load %arg9[%c0_73, %c0_74] : memref<24x256xbf16, #tpu.memory_space<vmem>>, vector<24x256xbf16>
    tpu.vector_store %arg9[%c0_73, %c0_74], %169 {strides = array<i32>} : memref<24x256xbf16, #tpu.memory_space<vmem>>, vector<24x256xbf16>,
    return
  }
  func.func @transform_0(%arg0: i32) -> (i32, i32) {
    %c0_i32 = arith.constant 0 : i32
    %c0_i32_0 = arith.constant 0 : i32
    return %arg0, %c0_i32 : i32, i32
  }
  func.func @transform_1(%arg0: i32) -> (i32, i32) {
    %c0_i32 = arith.constant 0 : i32
    %c0_i32_0 = arith.constant 0 : i32
    %c0_i32_1 = arith.constant 0 : i32
    return %c0_i32, %c0_i32_0 : i32, i32
  }
  func.func @transform_2(%arg0: i32) -> (i32, i32, i32) {
    %c0_i32 = arith.constant 0 : i32
    %c0_i32_0 = arith.constant 0 : i32
    %c0_i32_1 = arith.constant 0 : i32
    %c0_i32_2 = arith.constant 0 : i32
    return %c0_i32, %c0_i32_0, %c0_i32_1 : i32, i32, i32
  }
  func.func @transform_3(%arg0: i32) -> (i32, i32, i32) {
    %c0_i32 = arith.constant 0 : i32
    %c0_i32_0 = arith.constant 0 : i32
    %c0_i32_1 = arith.constant 0 : i32
    %c0_i32_2 = arith.constant 0 : i32
    return %c0_i32, %c0_i32_0, %c0_i32_1 : i32, i32, i32
  }
  func.func @transform_4(%arg0: i32) -> (i32, i32, i32) {
    %c0_i32 = arith.constant 0 : i32
    %c0_i32_0 = arith.constant 0 : i32
    %c0_i32_1 = arith.constant 0 : i32
    %c0_i32_2 = arith.constant 0 : i32
    return %c0_i32, %c0_i32_0, %c0_i32_1 : i32, i32, i32
  }
  func.func @transform_5(%arg0: i32) -> (i32, i32, i32) {
    %c0_i32 = arith.constant 0 : i32
    %c0_i32_0 = arith.constant 0 : i32
    %c0_i32_1 = arith.constant 0 : i32
    %c0_i32_2 = arith.constant 0 : i32
    return %c0_i32, %c0_i32_0, %c0_i32_1 : i32, i32, i32
  }
  func.func @transform_6(%arg0: i32) -> (i32, i32) {
    %c0_i32 = arith.constant 0 : i32
    %c0_i32_0 = arith.constant 0 : i32
    return %arg0, %c0_i32 : i32, i32
  }
  func.func @transform_7(%arg0: i32) -> (i32, i32) {
    %c0_i32 = arith.constant 0 : i32
    %c0_i32_0 = arith.constant 0 : i32
    return %arg0, %c0_i32 : i32, i32
  }
  func.func @transform_8(%arg0: i32) -> (i32, i32) {
    %c0_i32 = arith.constant 0 : i32
    %c0_i32_0 = arith.constant 0 : i32
    return %arg0, %c0_i32 : i32, i32
  }
}

</mosaic_0001>

<bundles_post_ra>
// kernel: user_encoder_forward.1
= control target key start
LH: loop header
LB: loop body
LE: loop exit
PB: predicated region body
PF: predicated region fallthrough
CT: control target
= control target key end

     0   :  { %v4598_v0 = vmov 0   ;;  %v4599_v9 = vmov 1   ;;  %vm517_vm0 = vcmask 1045504   ;;  %vm512_vm1 = vcmask 359424   ;;  %s6090_s1 = inlined_call_operand.vmem [shape: bf16[24,8], index: 1, kind: input, shape index: {}]   ;;  %s6091_s2 = inlined_call_operand.vmem [shape: bf16[3,300,256], index: 2, kind: input, shape index: {}]   ;;  %s6092_s0 = inlined_call_operand.vmem [shape: bf16[24,300], index: 0, kind: input, shape index: {}]   ;;  %s6093_s3 = inlined_call_operand.vmem [shape: bf16[3,256,256], index: 3, kind: input, shape index: {}]   ;;  %s6094_s5 = inlined_call_operand.vmem [shape: f32[3,3,256], index: 5, kind: input, shape index: {}]   ;;  %s6095_s6 = inlined_call_operand.vmem [shape: bf16[24,256], index: 6, kind: output, shape index: {0}]   ;;  %s6096_s4 = inlined_call_operand.vmem [shape: bf16[3,256,256], index: 4, kind: input, shape index: {}]   ;;  %s6097_s7 = inlined_call_operand.vmem [shape: bf16[24,256], index: 7, kind: output, shape index: {1}]   ;;  %s6098_s8 = inlined_call_operand.vmem [shape: bf16[24,256], index: 8, kind: output, shape index: {2}]  }
   0x1   :  { %4094 = vset.pattern.permute.xlu0 %v4598_v0  ;;  %v33_v1 = vld [vmem:[%s6090_s1] sm:$0xf]  ;;  %v34_v2 = vld [vmem:[%s6090_s1 + $0x4] sm:$0xf]  ;;  %4095 = vset.pattern.permute.xlu1 %v4598_v0  ;;  %v35_v3 = vld [vmem:[%s6090_s1 + $0x8] sm:$0xf] }
   0x2   :  { %116 = vperm.xlu0 %4094, %v33_v1   ;;  %140 = vperm.xlu1 %4095, %v35_v3   ;;  %v4109_v4 = vld [vmem:[%s6091_s2 + $0x1a4] ss:$8 sps:$4 sm:$0xff]   ;;  %v4111_v5 = vld [vmem:[%s6091_s2 + $0x1a0] ss:$8 sps:$4 sm:$0xff]   ;;  %v4112_v6 = vld [vmem:[%s6091_s2 + $0x194] ss:$8 sps:$4 sm:$0xff]  }
   0x3   :  { %524 = vmatprep.subr.bf16.mxu0 %v4109_v4  ;;  %v4114_v7 = vld [vmem:[%s6091_s2 + $0x190] ss:$8 sps:$4 sm:$0xff]   ;;  %v4115_v8 = vld [vmem:[%s6091_s2 + $0x184] ss:$8 sps:$4 sm:$0xff]   ;;  %v4117_v10 = vld [vmem:[%s6091_s2 + $0x180] ss:$8 sps:$4 sm:$0xff]  }
   0x4   :  { %525 = vmatpush1.bf16.msra.mxu0 %v4111_v5  ;;  %v4118_v11 = vld [vmem:[%s6091_s2 + $0x174] ss:$8 sps:$4 sm:$0xff]   ;;  %v4120_v12 = vld [vmem:[%s6091_s2 + $0x170] ss:$8 sps:$4 sm:$0xff]   ;;  %v4121_v13 = vld [vmem:[%s6091_s2 + $0x164] ss:$8 sps:$4 sm:$0xff]  }
   0x5   :  { %526 = vmatprep.subr.bf16.mxu0 %v4112_v6  ;;  %v4135_v14 = vld [vmem:[%s6091_s2 + $0x74] ss:$8 sps:$4 sm:$0xff]   ;;  %v4138_v15 = vld [vmem:[%s6091_s2 + $0x70] ss:$8 sps:$4 sm:$0xff]   ;;  %v4123_v16 = vld [vmem:[%s6091_s2 + $0x160] ss:$8 sps:$4 sm:$0xff]  }
   0x6   :  { %128 = vperm.xlu0 %4094, %v34_v2   ;;  %4096 = vset.pattern.permute.xlu1 %v4599_v9  ;;  %v4141_v17 = vld [vmem:[%s6091_s2 + $0x64] ss:$8 sps:$4 sm:$0xff]   ;;  %v4144_v18 = vld [vmem:[%s6091_s2 + $0x60] ss:$8 sps:$4 sm:$0xff]   ;;  %v4124_v19 = vld [vmem:[%s6091_s2 + $0x154] ss:$8 sps:$4 sm:$0xff]  }
   0x7   :  { %195 = vperm.xlu1 %4096, %v33_v1   ;;  %826 = vmatprep.subr.bf16.mxu1 %v4135_v14  ;;  %v4147_v20 = vld [vmem:[%s6091_s2 + $0x54] ss:$8 sps:$4 sm:$0xff]   ;;  %v4126_v21 = vld [vmem:[%s6091_s2 + $0x150] ss:$8 sps:$4 sm:$0xff]   ;;  %v4127_v23 = vld [vmem:[%s6091_s2 + $0x144] ss:$8 sps:$4 sm:$0xff]  }
   0x8   :  { %527 = vmatpush1.bf16.msra.mxu0 %v4114_v7  ;;  %827 = vmatpush1.bf16.msra.mxu1 %v4138_v15  ;;  %v4150_v22 = vld [vmem:[%s6091_s2 + $0x50] ss:$8 sps:$4 sm:$0xff]   ;;  %v4153_v24 = vld [vmem:[%s6091_s2 + $0x44] ss:$8 sps:$4 sm:$0xff]   ;;  %v4129_v25 = vld [vmem:[%s6091_s2 + $0x140] ss:$8 sps:$4 sm:$0xff]  }
   0x9   :  { %528 = vmatprep.subr.bf16.mxu0 %v4115_v8  ;;  %828 = vmatprep.subr.bf16.mxu1 %v4141_v17  ;;  %v4130_v26 = vld [vmem:[%s6091_s2 + $0x134] ss:$8 sps:$4 sm:$0xff]   ;;  %v4156_v27 = vld [vmem:[%s6091_s2 + $0x40] ss:$8 sps:$4 sm:$0xff]   ;;  %v4132_v29 = vld [vmem:[%s6091_s2 + $0x130] ss:$8 sps:$4 sm:$0xff]  }
   0xa   :  { %4097 = vset.pattern.permute.xlu0 %v4599_v9  ;;  %v4159_v28 = vld [vmem:[%s6091_s2 + $0x34] ss:$8 sps:$4 sm:$0xff]   ;;  %v4162_v30 = vld [vmem:[%s6091_s2 + $0x30] ss:$8 sps:$4 sm:$0xff]   ;;  %v4133_v31 = vld [vmem:[%s6091_s2 + $0x224] ss:$8 sps:$4 sm:$0xff]  }
   0xb   :  { %206 = vperm.xlu0 %4097, %v34_v2   ;;  %217 = vperm.xlu1 %4096, %v35_v3   ;;  %v4165_v32 = vld [vmem:[%s6091_s2 + $0x24] ss:$8 sps:$4 sm:$0xff]   ;;  %v4137_v33 = vld [vmem:[%s6091_s2 + $0x220] ss:$8 sps:$4 sm:$0xff]   ;;  %v4139_v34 = vld [vmem:[%s6091_s2 + $0x214] ss:$8 sps:$4 sm:$0xff]  }
   0xc   :  { %529 = vmatpush1.bf16.msra.mxu0 %v4117_v10  ;;  %829 = vmatpush1.bf16.msra.mxu1 %v4144_v18  ;;  %v4168_v35 = vld [vmem:[%s6091_s2 + $0x20] ss:$8 sps:$4 sm:$0xff]   ;;  %v4171_v36 = vld [vmem:[%s6091_s2 + $0x14] ss:$8 sps:$4 sm:$0xff]   ;;  %v4760_v37 = vld [vmem:[%s6092_s0 + $0x4] ss:$12 sps:$4 sm:$0xff]  }
   0xd   :  { %530 = vmatprep.subr.bf16.mxu0 %v4118_v11  ;;  %830 = vmatprep.subr.bf16.mxu1 %v4147_v20  ;;  %v4143_v38 = vld [vmem:[%s6091_s2 + $0x210] ss:$8 sps:$4 sm:$0xff]   ;;  %v4145_v40 = vld [vmem:[%s6091_s2 + $0x204] ss:$8 sps:$4 sm:$0xff]   ;;  %v4149_v42 = vld [vmem:[%s6091_s2 + $0x200] ss:$8 sps:$4 sm:$0xff]  }
   0xe   :  { %v4174_v39 = vld [vmem:[%s6091_s2 + $0x10] ss:$8 sps:$4 sm:$0xff]   ;;  %556 = vmatprep.mubr.bf16.mxu0 %v4760_v37  ;;  %v4177_v41 = vld [vmem:[%s6091_s2 + $0x4] ss:$8 sps:$4 sm:$0xff]   ;;  %v4151_v43 = vld [vmem:[%s6091_s2 + $0x1f4] ss:$8 sps:$4 sm:$0xff]  }
   0xf   :  { %v4180_v44 = vld [vmem:[%s6091_s2] ss:$8 sps:$4 sm:$0xff]   ;;  %v4184_v45 = vld [vmem:[%s6091_s2 + $0xf4] ss:$8 sps:$4 sm:$0xff]   ;;  %v4155_v46 = vld [vmem:[%s6091_s2 + $0x1f0] ss:$8 sps:$4 sm:$0xff]  }
  0x10   :  { %531 = vmatpush1.bf16.msra.mxu0 %v4120_v12  ;;  %831 = vmatpush1.bf16.msra.mxu1 %v4150_v22  ;;  %v4157_v47 = vld [vmem:[%s6091_s2 + $0x1e4] ss:$8 sps:$4 sm:$0xff]   ;;  %v4186_v48 = vld [vmem:[%s6091_s2 + $0xf0] ss:$8 sps:$4 sm:$0xff]   ;;  %v4161_v50 = vld [vmem:[%s6091_s2 + $0x1e0] ss:$8 sps:$4 sm:$0xff]  }
  0x11   :  { %532 = vmatprep.subr.bf16.mxu0 %v4121_v13  ;;  %832 = vmatprep.subr.bf16.mxu1 %v4153_v24  ;;  %v4189_v49 = vld [vmem:[%s6091_s2 + $0xe4] ss:$8 sps:$4 sm:$0xff]   ;;  %v4192_v51 = vld [vmem:[%s6091_s2 + $0xe0] ss:$8 sps:$4 sm:$0xff]   ;;  %v4163_v52 = vld [vmem:[%s6091_s2 + $0x1d4] ss:$8 sps:$4 sm:$0xff]  }
  0x12   :  { %v4198_v53 = vld [vmem:[%s6091_s2 + $0xd4] ss:$8 sps:$4 sm:$0xff]   ;;  %v4167_v54 = vld [vmem:[%s6091_s2 + $0x1d0] ss:$8 sps:$4 sm:$0xff]   ;;  %v4169_v55 = vld [vmem:[%s6091_s2 + $0x1c4] ss:$8 sps:$4 sm:$0xff]  }
  0x13   :  { %v4200_v56 = vld [vmem:[%s6091_s2 + $0xd0] ss:$8 sps:$4 sm:$0xff]   ;;  %v4204_v57 = vld [vmem:[%s6091_s2 + $0xc4] ss:$8 sps:$4 sm:$0xff]   ;;  %v4173_v58 = vld [vmem:[%s6091_s2 + $0x1c0] ss:$8 sps:$4 sm:$0xff]  }
  0x14   :  { %533 = vmatpush1.bf16.msra.mxu0 %v4123_v16  ;;  %833 = vmatpush1.bf16.msra.mxu1 %v4156_v27  ;;  %v4175_v59 = vld [vmem:[%s6091_s2 + $0x1b4] ss:$8 sps:$4 sm:$0xff]   ;;  %v4206_v60 = vld [vmem:[%s6091_s2 + $0xc0] ss:$8 sps:$4 sm:$0xff]   ;;  %v4179_v62 = vld [vmem:[%s6091_s2 + $0x1b0] ss:$8 sps:$4 sm:$0xff]  }
  0x15   :  { %534 = vmatprep.subr.bf16.mxu0 %v4124_v19  ;;  %834 = vmatprep.subr.bf16.mxu1 %v4159_v28  ;;  %v4208_v61 = vld [vmem:[%s6091_s2 + $0xb4] ss:$8 sps:$4 sm:$0xff]   ;;  %v4191_v1 = vld [vmem:[%s6091_s2 + $0x250] ss:$8 sps:$4 sm:$0x3f]   ;;  %vm109_vm3 = vcmask 1040384  }
  0x16   :  { %v4187_v63 = vld [vmem:[%s6091_s2 + $0x254] ss:$8 sps:$4 sm:$0x3f]   ;;  %v4210_v3 = vld [vmem:[%s6091_s2 + $0xb0] ss:$8 sps:$4 sm:$0xff]   ;;  %v519_v8 = vsel %vm517_vm0, %v4191_v1, 0 }
  0x17   :  { %v31_v2 = vld [vmem:[%s6092_s0 + $0x18] sm:$0xff]  ;;  %v4211_v4 = vld [vmem:[%s6091_s2 + $0xa4] ss:$8 sps:$4 sm:$0xff]   ;;  %v4215_v9 = vld [vmem:[%s6091_s2 + $0xa0] ss:$8 sps:$4 sm:$0xff]   ;;  %vm188_vm6 = vcmask 1043456  }
  0x18   :  { %535 = vmatpush1.bf16.msra.mxu0 %v4126_v21  ;;  %835 = vmatpush1.bf16.msra.mxu1 %v4162_v30  ;;  %v4856_v5 = vld [vmem:[%s6092_s0] ss:$12 sps:$4 sm:$0xff]   ;;  %v4858_v6 = vcombine.high %v31_v2, %v31_v2  ;;  %v4218_v10 = vld [vmem:[%s6091_s2 + $0x94] ss:$8 sps:$4 sm:$0xff]   ;;  %v4223_v13 = vld [vmem:[%s6091_s2 + $0x90] ss:$8 sps:$4 sm:$0xff]   ;;  %v4885_v15 = vcombine.low %v31_v2, %v31_v2 }
  0x19   :  { %536 = vmatprep.subr.bf16.mxu0 %v4127_v23  ;;  %836 = vmatprep.subr.bf16.mxu1 %v4165_v32  ;;  %v4197_v7 = vld [vmem:[%s6091_s2 + $0x244] ss:$8 sps:$4 sm:$0xff]   ;;  %v4195_v11 = vld [vmem:[%s6091_s2 + $0x240] ss:$8 sps:$4 sm:$0xff]   ;;  %v4203_v12 = vld [vmem:[%s6091_s2 + $0x234] ss:$8 sps:$4 sm:$0xff]  }
  0x1a   :  { %v4224_v14 = vld [vmem:[%s6091_s2 + $0x84] ss:$8 sps:$4 sm:$0xff]   ;;  %v4201_v16 = vld [vmem:[%s6091_s2 + $0x230] ss:$8 sps:$4 sm:$0xff]   ;;  %v4229_v18 = vld [vmem:[%s6091_s2 + $0x80] ss:$8 sps:$4 sm:$0xff]  }
  0x1b   :  { %v4213_v17 = vld [vmem:[%s6091_s2 + $0x124] ss:$8 sps:$4 sm:$0x3f]   ;;  %v4232_v19 = vld [vmem:[%s6091_s2 + $0x2d4] ss:$8 sps:$4 sm:$0xff]   ;;  %v66_v32 = vshrl.u32 %v4760_v37, 16 }
  0x1c   :  { %537 = vmatpush1.bf16.msra.mxu0 %v4129_v25  ;;  %837 = vmatpush1.bf16.msra.mxu1 %v4168_v35  ;;  %v4216_v20 = vld [vmem:[%s6091_s2 + $0x120] ss:$8 sps:$4 sm:$0x3f]   ;;  %v4222_v23 = vld [vmem:[%s6091_s2 + $0x114] ss:$8 sps:$4 sm:$0xff]   ;;  %vm1483_vm9 = vcmask 1046528  }
  0x1d   :  { %538 = vmatprep.subr.bf16.mxu0 %v4130_v26  ;;  %838 = vmatprep.subr.bf16.mxu1 %v4171_v36  ;;  %v4908_v21 = vld [vmem:[%s6092_s0 + $0x8] ss:$12 sps:$4 sm:$0xff]   ;;  %v821_v22 = vsel %vm517_vm0, %v4216_v20, 0  ;;  %v4220_v24 = vld [vmem:[%s6091_s2 + $0x110] ss:$8 sps:$4 sm:$0xff]   ;;  %vm1492_vm10 = vcmask 1042432  }
  0x1e   :  { %v4228_v25 = vld [vmem:[%s6091_s2 + $0x104] ss:$8 sps:$4 sm:$0xff]   ;;  %v4926_v26 = vld [vmem:[%s6092_s0 + $0x20] ss:$0 sps:$4 sm:$0xff]   ;;  %v73_v35 = vshrl.u32 %v4908_v21, 16  ;;  %vm2464_vm12 = vcmask 1041408  }
  0x1f   :  { %v4226_v27 = vld [vmem:[%s6091_s2 + $0x100] ss:$8 sps:$4 sm:$0xff]   ;;  %v4260_v28 = vld [vmem:[%s6091_s2 + $0x384] ss:$8 sps:$4 sm:$0x3f]  }
  0x20   :  { %539 = vmatpush1.bf16.msra.mxu0 %v4132_v29  ;;  %839 = vmatpush1.bf16.msra.mxu1 %v4174_v39  ;;  %v4600_v29 = vmov 839922192   ;;  %v62_v39 = vshll.u32 %v4856_v5, 16  ;;  %vm57_vm2 = vsmask.f32 256 }
  0x21   :  { %540 = vmatprep.subr.bf16.mxu0 %v4133_v31  ;;  %840 = vmatprep.subr.bf16.mxu1 %v4177_v41  ;;  %v120_v30 = vunpack.c.l.s4 %v4600_v29  ;;  %v122_v31 = vlaneseq  ;;  %v68_v41 = vrot.slane %v66_v32, 7  ;;  %vm4962_vm4 = vmand %vm109_vm3, %vm57_vm2  ;;  %vm166_vm5 = vsmask.f32 7424 }
  0x22   :  { %vm189_vm7 = vsmask.f32 3328  ;;  %vm2425_vm11 = vsmask.f32 1280  ;;  %vm2515_vm14 = vsmask.f32 6400 }
  0x23   :  { %v121_v36 = vunpack.c.0.s8 %v120_v30  ;;  %vm5050_vm8 = vmand %vm188_vm6, %vm189_vm7  ;;  %vm2535_vm15 = vsmask.f32 2304 }
  0x24   :  { %541 = vmatpush2.bf16.msra.mxu0 %v4137_v33  ;;  %841 = vmatpush1.bf16.msra.mxu1 %v4180_v44  ;;  %v59_v33 = vshrl.u32 %v4856_v5, 16  ;;  %v75_v44 = vrot.slane %v73_v35, 7  ;;  %vm5891_vm13 = vmand %vm2464_vm12, %vm2425_vm11 }
  0x25   :  { %542 = vmatprep.subr.bf16.mxu0 %v4139_v34  ;;  %842 = vmatprep.subr.bf16.mxu1 %v4184_v45  ;;  %v88_v34 = vshrl.u32 %v4858_v6, 16  ;;  %v76_v45 = vshll.u32 %v4908_v21, 16 }
  0x27   :  { %v175_v29 = vrot.slane %v76_v45, 1 }
  0x28   :  { %543 = vmatpush2.bf16.msra.mxu0 %v4143_v38  ;;  %843 = vmatpush2.bf16.msra.mxu1 %v4186_v48  ;;  %v4942_v38 = vshrl.u32 %v122_v31, 7  ;;  %v80_v48 = vshrl.u32 %v4885_v15, 16 }
  0x29   :  { %544 = vmatprep.subr.bf16.mxu0 %v4145_v40  ;;  %844 = vmatprep.subr.bf16.mxu1 %v4189_v49  ;;  %v91_v40 = vshll.u32 %v4858_v6, 16 }
  0x2b   :  { %v5003_v31 = vrot.slane %v91_v40, 1 }
  0x2c   :  { %545 = vmatpush2.bf16.msra.mxu0 %v4149_v42  ;;  %845 = vmatpush2.bf16.msra.mxu1 %v4192_v51  ;;  %v69_v42 = vshll.u32 %v4760_v37, 16  ;;  %v96_v37 = vshrl.u32 %v4926_v26, 16 }
  0x2d   :  { %546 = vmatprep.subr.bf16.mxu0 %v4151_v43  ;;  %846 = vmatprep.subr.bf16.mxu1 %v4198_v53  ;;  %v90_v43 = vrot.slane %v88_v34, 7  ;;  %v78_v53 = vor.u32 %v76_v45, %v75_v44  ;;  %v4274_v45 = vld [vmem:[%s6091_s2 + $0x364] ss:$8 sps:$4 sm:$0xff]  }
  0x2e   :  { %v71_v51 = vor.u32 %v69_v42, %v68_v41 }
  0x30   :  { %547 = vmatpush2.bf16.msra.mxu0 %v4155_v46  ;;  %847 = vmatpush2.bf16.msra.mxu1 %v4200_v56  ;;  %v61_v46 = vrot.slane %v59_v33, 7  ;;  %v93_v56 = vor.u32 %v91_v40, %v90_v43  ;;  %v112_v1 = vsel %vm4962_vm4, 0, %v71_v51  ;;  %v4266_v40 = vld [vmem:[%s6091_s2 + $0x370] ss:$8 sps:$4 sm:$0xff]  }
  0x31   :  { %548 = vmatprep.subr.bf16.mxu0 %v4157_v47  ;;  %848 = vmatprep.subr.bf16.mxu1 %v4204_v57  ;;  %v4955_v47 = vsub.s32 %v121_v36, %v4942_v38  ;;  %v82_v57 = vrot.slane %v80_v48, 7  ;;  %v4236_v51 = vld [vmem:[%s6091_s2 + $0x2b0] ss:$8 sps:$4 sm:$0xff]  }
  0x34   :  { %549 = vmatpush2.bf16.msra.mxu0 %v4161_v50  ;;  %849 = vmatpush2.bf16.msra.mxu1 %v4206_v60 }
  0x35   :  { %550 = vmatprep.subr.bf16.mxu0 %v4163_v52  ;;  %850 = vmatprep.subr.bf16.mxu1 %v4208_v61  ;;  %v98_v61 = vrot.slane %v96_v37, 7 }
  0x38   :  { %551 = vmatpush2.bf16.msra.mxu0 %v4167_v54  ;;  %851 = vmatpush2.bf16.msra.mxu1 %v4210_v3  ;;  %v113_v3 = vsel %vm4962_vm4, 0, %v78_v53  ;;  %v4241_v53 = vld [vmem:[%s6091_s2 + $0x2a4] ss:$8 sps:$4 sm:$0xff]   ;;  %v4272_v54 = vld [vmem:[%s6091_s2 + $0x360] ss:$8 sps:$4 sm:$0xff]  }
  0x39   :  { %552 = vmatprep.subr.bf16.mxu0 %v4169_v55  ;;  %852 = vmatprep.subr.bf16.mxu1 %v4211_v4  ;;  %v64_v55 = vor.u32 %v62_v39, %v61_v46  ;;  %v171_v4 = vrot.slane %v69_v42, 1 }
  0x3c   :  { %553 = vmatpush2.bf16.msra.mxu0 %v4173_v58  ;;  %853 = vmatpush2.bf16.msra.mxu1 %v4215_v9  ;;  %v83_v58 = vshll.u32 %v4885_v15, 16 }
  0x3d   :  { %554 = vmatprep.subr.bf16.mxu0 %v4175_v59  ;;  %854 = vmatprep.subr.bf16.mxu1 %v4218_v10  ;;  %v99_v59 = vshll.u32 %v4926_v26, 16  ;;  %v4262_v10 = vld [vmem:[%s6091_s2 + $0x380] ss:$8 sps:$4 sm:$0x3f]  }
  0x40   :  { %555 = vmatpush2.bf16.msra.mxu0 %v4179_v62  ;;  %855 = vmatpush2.bf16.msra.mxu1 %v4223_v13 }
  0x41   :  { %3616 = vmatprep.subr.msk.bf16.mxu0 %vm517_vm0, %v4187_v63  ;;  %856 = vmatprep.subr.bf16.mxu1 %v4224_v14 }
  0x43   :  { %557 = vmatmul.mubr.bf16.vlgmr.msra.gmra.mxu0 %v4856_v5 }
  0x44   :  { %586 = vmatpush1.bf16.msra.mxu0 %v519_v8  ;;  %566 = vmatprep.mubr.bf16.mxu0 %v4858_v6  ;;  %v94_v8 = vsel %vm57_vm2, %v68_v41, %v93_v56  ;;  %v4238_v41 = vld [vmem:[%s6091_s2 + $0x2b4] ss:$8 sps:$4 sm:$0xff]  }
  0x45   :  { %587 = vmatprep.subr.bf16.mxu0 %v4197_v7  ;;  %857 = vmatpush2.bf16.msra.mxu1 %v4229_v18  ;;  %v111_v7 = vsel %vm4962_vm4, 0, %v64_v55  ;;  %v4239_v55 = vld [vmem:[%s6091_s2 + $0x2a0] ss:$8 sps:$4 sm:$0xff]   ;;  %v4244_v56 = vld [vmem:[%s6091_s2 + $0x294] ss:$8 sps:$4 sm:$0xff]  }
  0x46   :  { %1167 = vmatprep.subr.bf16.mxu1 %v4232_v19 }
  0x48   :  { %588 = vmatpush1.bf16.msra.mxu0 %v4195_v11  ;;  %v101_v11 = vor.u32 %v99_v59, %v98_v61  ;;  %v4242_v61 = vld [vmem:[%s6091_s2 + $0x290] ss:$8 sps:$4 sm:$0xff]  }
  0x49   :  { %589 = vmatprep.subr.bf16.mxu0 %v4203_v12  ;;  %v85_v12 = vor.u32 %v83_v58, %v82_v57 }
  0x4a   :  { %v102_v30 = vsel %vm57_vm2, %v75_v44, %v101_v11  ;;  %v4257_v11 = vld [vmem:[%s6091_s2 + $0x340] ss:$8 sps:$4 sm:$0xff]  }
  0x4b   :  { %567 = vmatmul.mubr.bf16.gmra.mxu0 %v4885_v15  ;;  %v86_v36 = vsel %vm57_vm2, %v61_v46, %v85_v12  ;;  %v4265_v12 = vld [vmem:[%s6091_s2 + $0x334] ss:$8 sps:$4 sm:$0xff]  }
  0x4c   :  { %590 = vmatpush1.bf16.msra.mxu0 %v4201_v16  ;;  %607 = vmatprep.mubr.bf16.mxu0 %v4598_v0 }
  0x4d   :  { %3657 = vmatprep.subr.msk.bf16.mxu0 %vm517_vm0, %v4213_v17  ;;  %v4230_v17 = vld [vmem:[%s6091_s2 + $0x2d0] ss:$8 sps:$4 sm:$0xff]  }
  0x53   :  { %3617 = vmatmul.mubr.msk.bf16.vlgmr.msra.gmra.mxu0 %vm512_vm1, %v4908_v21 }
  0x54   :  { %888 = vmatpush1.bf16.msra.mxu0 %v821_v22  ;;  %617 = vmatprep.mubr.bf16.mxu0 %v4598_v0  ;;  %v172_v22 = vor.u32 %v171_v4, %v66_v32  ;;  %v4233_v32 = vld [vmem:[%s6091_s2 + $0x2c0] ss:$8 sps:$4 sm:$0xff]   ;;  %v4248_v4 = vld [vmem:[%s6091_s2 + $0x270] ss:$8 sps:$4 sm:$0xff]  }
  0x55   :  { %889 = vmatprep.subr.bf16.mxu0 %v4222_v23  ;;  %v4235_v23 = vld [vmem:[%s6091_s2 + $0x2c4] ss:$8 sps:$4 sm:$0xff]  }
  0x56   :  { %v174_v42 = vsel %vm166_vm5, %v172_v22, %v5003_v31  ;;  %v4278_v22 = vld [vmem:[%s6091_s2 + $0x300] ss:$8 sps:$4 sm:$0xff]  }
  0x58   :  { %890 = vmatpush1.bf16.msra.mxu0 %v4220_v24  ;;  %v1162_v24 = vsel %vm517_vm0, %v4262_v10, 0  ;;  %v4259_v10 = vld [vmem:[%s6091_s2 + $0x344] ss:$8 sps:$4 sm:$0xff]  }
  0x59   :  { %891 = vmatprep.subr.bf16.mxu0 %v4228_v25  ;;  %v4268_v25 = vld [vmem:[%s6091_s2 + $0x374] ss:$8 sps:$4 sm:$0xff]  }
  0x5b   :  { %3618 = vmatmul.mubr.msk.bf16.gmra.mxu0 %vm512_vm1, %v4926_v26 }
  0x5c   :  { %892 = vmatpush1.bf16.msra.mxu0 %v4226_v27  ;;  %909 = vmatprep.mubr.bf16.mxu0 %v4598_v0 }
  0x5d   :  { %3736 = vmatprep.subr.msk.bf16.mxu0 %vm517_vm0, %v4260_v28  ;;  %vm2536_vm0 = vmand %vm1492_vm10, %vm2535_vm15 }
  0x7d   :  { %v117_v49 = vpop.permute.xlu0 %116  ;;  %v141_v50 = vpop.permute.xlu1 %140 }
  0x7e   :  { %v149_v52 = vrot.slane %v141_v50, %v4955_v47  ;;  %v125_v62 = vrot.slane %v117_v49, %v4955_v47  ;;  %v176_v49 = vor.u32 %v175_v29, %v73_v35  ;;  %v177_v50 = vrot.slane %v99_v59, 1 }
  0x80   :  { %v3537_v2 = vcombine.low %v149_v52, %v149_v52  ;;  %v178_v21 = vsel %vm166_vm5, %v176_v49, %v177_v50 }
  0x81   :  { %v129_v60 = vpop.permute.xlu0 %128 }
  0x82   :  { %v137_v63 = vrot.slane %v129_v60, %v4955_v47  ;;  %v196_v13 = vpop.permute.xlu1 %195  ;;  %v164_v19 = vmul.bf16 %v3537_v2, %v94_v8  ;;  %v165_v43 = vmul.bf16 %v3537_v2, %v102_v30  ;;  %v163_v46 = vmul.bf16 %v3537_v2, %v86_v36  ;;  %v4250_v2 = vld [vmem:[%s6091_s2 + $0x274] ss:$8 sps:$4 sm:$0xff]  }
  0x83   :  { %v204_v27 = vrot.slane %v196_v13, %v4955_v47  ;;  %v181_v60 = vor.u32 %v177_v50, %v96_v37  ;;  %v4245_v37 = vld [vmem:[%s6091_s2 + $0x280] ss:$8 sps:$4 sm:$0xff]   ;;  %v4256_v8 = vld [vmem:[%s6091_s2 + $0x354] ss:$8 sps:$4 sm:$0xff]   ;;  %v4263_v13 = vld [vmem:[%s6091_s2 + $0x330] ss:$8 sps:$4 sm:$0xff]  }
  0x84   :  { %v3536_v9 = vcombine.low %v125_v62, %v137_v63  ;;  %v4247_v63 = vld [vmem:[%s6091_s2 + $0x284] ss:$8 sps:$4 sm:$0xff]  }
  0x85   :  { %v193_v26 = vsel %vm5050_vm8, %v181_v60, 0  ;;  %v4287_v60 = vld [vmem:[%s6093_s3 + $0x170] ss:$8 sps:$4 sm:$0xff]   ;;  %v4292_v62 = vld [vmem:[%s6093_s3 + $0x164] ss:$8 sps:$4 sm:$0xff]  }
  0x86   :  { %v161_v14 = vmul.bf16 %v3536_v9, %v112_v1  ;;  %v162_v16 = vmul.bf16 %v3536_v9, %v113_v3  ;;  %v160_v18 = vmul.bf16 %v3536_v9, %v111_v7  ;;  %v207_v20 = vpop.permute.xlu0 %206  ;;  %v218_v35 = vpop.permute.xlu1 %217  ;;  %v4251_v7 = vld [vmem:[%s6091_s2 + $0x260] ss:$8 sps:$4 sm:$0xff]   ;;  %v4254_v9 = vld [vmem:[%s6091_s2 + $0x350] ss:$8 sps:$4 sm:$0xff]  }
  0x87   :  { %v215_v28 = vrot.slane %v207_v20, %v4955_v47  ;;  %v226_v59 = vrot.slane %v218_v35, %v4955_v47  ;;  %v167_v20 = vrot.slane %v62_v39, 1  ;;  %v4286_v39 = vld [vmem:[%s6091_s2 + $0x2e4] ss:$8 sps:$4 sm:$0xff]  }
  0x88   :  { %858 = vmatprep.mubr.bf16.mxu1 %v161_v14  ;;  %3658 = vmatmul.mubr.msk.bf16.vlgmr.msra.gmra.mxu0 %vm512_vm1, %v162_v16  ;;  %v4271_v14 = vld [vmem:[%s6091_s2 + $0x324] ss:$8 sps:$4 sm:$0xff]   ;;  %v4269_v16 = vld [vmem:[%s6091_s2 + $0x320] ss:$8 sps:$4 sm:$0xff]  }
  0x89   :  { %859 = vmatmul.mubr.bf16.vlgmr.msra.gmra.mxu1 %v160_v18  ;;  %919 = vmatprep.mubr.bf16.mxu0 %v4598_v0  ;;  %v5017_v44 = vcombine.low %v204_v27, %v215_v28  ;;  %v3539_v1 = vcombine.low %v226_v59, %v226_v59  ;;  %v4275_v18 = vld [vmem:[%s6091_s2 + $0x310] ss:$8 sps:$4 sm:$0xff]   ;;  %v169_v27 = vrot.slane %v83_v58, 1  ;;  %v180_v28 = vor.u32 %v5003_v31, %v88_v34 }
  0x8a   :  { %1168 = vmatpush1.bf16.msra.mxu1 %v4230_v17  ;;  %868 = vmatprep.mubr.bf16.mxu1 %v164_v19  ;;  %v4277_v17 = vld [vmem:[%s6091_s2 + $0x314] ss:$8 sps:$4 sm:$0xff]   ;;  %v4280_v19 = vld [vmem:[%s6091_s2 + $0x304] ss:$8 sps:$4 sm:$0xff]  }
  0x8b   :  { %1169 = vmatprep.subr.bf16.mxu1 %v4235_v23  ;;  %1229 = vmatpush1.bf16.msra.mxu0 %v1162_v24  ;;  %v238_v52 = vmul.bf16 %v5017_v44, %v174_v42  ;;  %v239_v57 = vmul.bf16 %v5017_v44, %v178_v21  ;;  %v242_v3 = vmul.bf16 %v3539_v1, %v193_v26  ;;  %v4283_v23 = vld [vmem:[%s6091_s2 + $0x2f4] ss:$8 sps:$4 sm:$0xff]   ;;  %v192_v30 = vsel %vm5050_vm8, %v180_v28, 0  ;;  %v4290_v26 = vld [vmem:[%s6093_s3 + $0x160] ss:$8 sps:$4 sm:$0xff]  }
  0x8c   :  { %1230 = vmatprep.subr.bf16.mxu0 %v4268_v25  ;;  %v168_v24 = vor.u32 %v167_v20, %v59_v33  ;;  %v4281_v25 = vld [vmem:[%s6091_s2 + $0x2f0] ss:$8 sps:$4 sm:$0xff]   ;;  %v4284_v33 = vld [vmem:[%s6091_s2 + $0x2e0] ss:$8 sps:$4 sm:$0xff]   ;;  %v179_v6 = vor.u32 %v169_v27, %v80_v48 }
  0x8e   :  { %1170 = vmatpush1.bf16.msra.mxu1 %v4233_v32  ;;  %v170_v5 = vsel %vm166_vm5, %v168_v24, %v169_v27  ;;  %v241_v32 = vmul.bf16 %v3539_v1, %v192_v30  ;;  %v191_v34 = vsel %vm5050_vm8, %v179_v6, 0  ;;  %v4311_v30 = vld [vmem:[%s6093_s3 + $0x40] ss:$8 sps:$4 sm:$0xff]  }
  0x8f   :  { %1171 = vmatprep.subr.bf16.mxu1 %v4238_v41  ;;  %1231 = vmatpush1.bf16.msra.mxu0 %v4266_v40  ;;  %v237_v29 = vmul.bf16 %v5017_v44, %v170_v5  ;;  %v240_v58 = vmul.bf16 %v3539_v1, %v191_v34  ;;  %v4295_v1 = vld [vmem:[%s6093_s3 + $0x74] ss:$8 sps:$4 sm:$0xff]  }
  0x90   :  { %3659 = vmatmul.mubr.msk.bf16.gmra.mxu0 %vm512_vm1, %v165_v43  ;;  %1232 = vmatprep.subr.bf16.mxu0 %v4274_v45  ;;  %v4310_v5 = vld [vmem:[%s6093_s3 + $0x134] ss:$8 sps:$4 sm:$0xff]  }
  0x91   :  { %869 = vmatmul.mubr.bf16.gmra.mxu1 %v163_v46  ;;  %1250 = vmatprep.mubr.bf16.mxu0 %v4598_v0 }
  0x92   :  { %1172 = vmatpush1.bf16.msra.mxu1 %v4236_v51  ;;  %1199 = vmatprep.mubr.bf16.mxu1 %v238_v52 }
  0x93   :  { %1173 = vmatprep.subr.bf16.mxu1 %v4241_v53  ;;  %1233 = vmatpush1.bf16.msra.mxu0 %v4272_v54 }
  0x96   :  { %1174 = vmatpush1.bf16.msra.mxu1 %v4239_v55 }
  0x97   :  { %1175 = vmatprep.subr.bf16.mxu1 %v4244_v56 }
  0x98   :  { %3737 = vmatmul.mubr.msk.bf16.vlgmr.msra.gmra.mxu0 %vm512_vm1, %v239_v57  ;;  %v4601_v57 = vmov 2  }
  0x99   :  { %1260 = vmatprep.mubr.bf16.mxu0 %v4598_v0  ;;  %v4253_v0 = vld [vmem:[%s6091_s2 + $0x264] ss:$8 sps:$4 sm:$0xff]   ;;  %4099 = vset.pattern.permute.xlu1 %v4601_v57 }
  0x9a   :  { %1176 = vmatpush1.bf16.msra.mxu1 %v4242_v61  ;;  %4098 = vset.pattern.permute.xlu0 %v4601_v57  ;;  %v4289_v61 = vld [vmem:[%s6093_s3 + $0x174] ss:$8 sps:$4 sm:$0xff]  }
  0x9b   :  { %1177 = vmatprep.subr.bf16.mxu1 %v4247_v63  ;;  %1771 = vmatprep.subr.bf16.mxu0 %v4289_v61  ;;  %v4293_v63 = vld [vmem:[%s6093_s3 + $0x70] ss:$8 sps:$4 sm:$0xff]  }
  0x9c   :  { %1772 = vmatpush1.bf16.msra.mxu0 %v4287_v60 }
  0x9d   :  { %1773 = vmatprep.subr.bf16.mxu0 %v4292_v62 }
  0x9e   :  { %1178 = vmatpush1.bf16.msra.mxu1 %v4245_v37 }
  0x9f   :  { %1179 = vmatprep.subr.bf16.mxu1 %v4250_v2  ;;  %v4298_v2 = vld [vmem:[%s6093_s3 + $0x154] ss:$8 sps:$4 sm:$0xff]  }
  0xa0   :  { %3738 = vmatmul.mubr.msk.bf16.gmra.mxu0 %vm512_vm1, %v242_v3 }
  0xa1   :  { %1774 = vmatpush1.bf16.msra.mxu0 %v4290_v26 }
  0xa2   :  { %1180 = vmatpush1.bf16.msra.mxu1 %v4248_v4  ;;  %v4299_v4 = vld [vmem:[%s6093_s3 + $0x60] ss:$8 sps:$4 sm:$0xff]   ;;  %1775 = vmatprep.subr.bf16.mxu0 %v4298_v2 }
  0xa3   :  { %1181 = vmatprep.subr.bf16.mxu1 %v4253_v0  ;;  %v4301_v0 = vld [vmem:[%s6093_s3 + $0x64] ss:$8 sps:$4 sm:$0xff]  }
  0xa6   :  { %1182 = vmatpush1.bf16.msra.mxu1 %v4251_v7 }
  0xa7   :  { %1183 = vmatprep.subr.bf16.mxu1 %v4256_v8 }
  0xaa   :  { %1184 = vmatpush2.bf16.msra.mxu1 %v4254_v9  ;;  %v4296_v9 = vld [vmem:[%s6093_s3 + $0x150] ss:$8 sps:$4 sm:$0xff]  }
  0xab   :  { %1185 = vmatprep.subr.bf16.mxu1 %v4259_v10  ;;  %1776 = vmatpush1.bf16.msra.mxu0 %v4296_v9 }
  0xae   :  { %1186 = vmatpush2.bf16.msra.mxu1 %v4257_v11  ;;  %v4304_v11 = vld [vmem:[%s6093_s3 + $0x144] ss:$8 sps:$4 sm:$0xff]  }
  0xaf   :  { %1187 = vmatprep.subr.bf16.mxu1 %v4265_v12  ;;  %1777 = vmatprep.subr.bf16.mxu0 %v4304_v11 }
  0xb2   :  { %1188 = vmatpush2.bf16.msra.mxu1 %v4263_v13 }
  0xb3   :  { %1189 = vmatprep.subr.bf16.mxu1 %v4271_v14 }
  0xb6   :  { %1190 = vmatpush2.bf16.msra.mxu1 %v4269_v16  ;;  %v4307_v16 = vld [vmem:[%s6093_s3 + $0x54] ss:$8 sps:$4 sm:$0xff]  }
  0xb7   :  { %1191 = vmatprep.subr.bf16.mxu1 %v4277_v17 }
  0xba   :  { %1192 = vmatpush2.bf16.msra.mxu1 %v4275_v18  ;;  %v4305_v18 = vld [vmem:[%s6093_s3 + $0x50] ss:$8 sps:$4 sm:$0xff]  }
  0xbb   :  { %1193 = vmatprep.subr.bf16.mxu1 %v4280_v19 }
  0xbe   :  { %1194 = vmatpush2.bf16.msra.mxu1 %v4278_v22 }
  0xbf   :  { %1195 = vmatprep.subr.bf16.mxu1 %v4283_v23  ;;  %v4313_v23 = vld [vmem:[%s6093_s3 + $0x44] ss:$8 sps:$4 sm:$0xff]  }
  0xc2   :  { %1196 = vmatpush2.bf16.msra.mxu1 %v4281_v25  ;;  %v4302_v25 = vld [vmem:[%s6093_s3 + $0x140] ss:$8 sps:$4 sm:$0xff]  }
  0xc3   :  { %1197 = vmatprep.subr.bf16.mxu1 %v4286_v39  ;;  %1778 = vmatpush1.bf16.msra.mxu0 %v4302_v25 }
  0xc4   :  { %1779 = vmatprep.subr.bf16.mxu0 %v4310_v5 }
  0xc6   :  { %1198 = vmatpush2.bf16.msra.mxu1 %v4284_v33 }
  0xc7   :  { %1982 = vmatprep.subr.bf16.mxu1 %v4295_v1 }
  0xc9   :  { %1200 = vmatmul.mubr.bf16.vlgmr.msra.gmra.mxu1 %v237_v29  ;;  %v4308_v29 = vld [vmem:[%s6093_s3 + $0x130] ss:$8 sps:$4 sm:$0xff]  }
  0xca   :  { %1209 = vmatprep.mubr.bf16.mxu1 %v241_v32  ;;  %1983 = vmatpush1.bf16.msra.mxu1 %v4293_v63  ;;  %v4319_v32 = vld [vmem:[%s6093_s3 + $0x34] ss:$8 sps:$4 sm:$0xff]  }
  0xcb   :  { %1984 = vmatprep.subr.bf16.mxu1 %v4301_v0  ;;  %1780 = vmatpush1.bf16.msra.mxu0 %v4308_v29 }
  0xce   :  { %1985 = vmatpush1.bf16.msra.mxu1 %v4299_v4 }
  0xcf   :  { %1986 = vmatprep.subr.bf16.mxu1 %v4307_v16 }
  0xd1   :  { %1210 = vmatmul.mubr.bf16.gmra.mxu1 %v240_v58 }
  0xd2   :  { %1987 = vmatpush1.bf16.msra.mxu1 %v4305_v18 }
  0xd3   :  { %1988 = vmatprep.subr.bf16.mxu1 %v4313_v23 }
  0xd6   :  { %1989 = vmatpush1.bf16.msra.mxu1 %v4311_v30 }
  0xd7   :  { %1990 = vmatprep.subr.bf16.mxu1 %v4319_v32 }
 0x103   :  { %v558_v31 = vpop.f32.mrf.mxu0 }
 0x105   :  { %v560_v36 = vpop.f32.mrf.mxu0 }
 0x107   :  { %v562_v41 = vpop.f32.mrf.mxu0 }
 0x109   :  { %v564_v40 = vpop.f32.mrf.mxu0 }
 0x10b   :  { %v568_v42 = vpop.f32.mrf.mxu0 }
 0x10d   :  { %v570_v43 = vpop.f32.mrf.mxu0 }
 0x10f   :  { %v572_v44 = vpop.f32.mrf.mxu0 }
 0x111   :  { %v573_v45 = vpop.f32.mrf.mxu0 }
 0x112   :  { %v4314_v45 = vld [vmem:[%s6093_s3 + $0x120] ss:$8 sps:$4 sm:$0xff]  }
 0x113   :  { %v609_v46 = vpop.f32.mrf.mxu0 }
 0x114   :  { %v610_v49 = vadd.f32 %v609_v46, %v558_v31  ;;  %v4316_v31 = vld [vmem:[%s6093_s3 + $0x124] ss:$8 sps:$4 sm:$0xff]  }
 0x115   :  { %v611_v50 = vpop.f32.mrf.mxu0  ;;  %1781 = vmatprep.subr.bf16.mxu0 %v4316_v31 }
 0x116   :  { %v612_v15 = vadd.f32 %v611_v50, %v560_v36  ;;  %1782 = vmatpush1.bf16.msra.mxu0 %v4314_v45  ;;  %v4328_v45 = vld [vmem:[%s6093_s3 + $0x104] ss:$8 sps:$4 sm:$0xff]  }
 0x117   :  { %v613_v48 = vpop.f32.mrf.mxu0 }
 0x118   :  { %v614_v51 = vadd.f32 %v613_v48, %v562_v41  ;;  %v4317_v41 = vld [vmem:[%s6093_s3 + $0x30] ss:$8 sps:$4 sm:$0xff]  }
 0x119   :  { %v615_v52 = vpop.f32.mrf.mxu0  ;;  %1991 = vmatpush1.bf16.msra.mxu1 %v4317_v41  ;;  %v4322_v41 = vld [vmem:[%s6093_s3 + $0x114] ss:$8 sps:$4 sm:$0xff]  }
 0x11a   :  { %v616_v53 = vadd.f32 %v615_v52, %v564_v40  ;;  %1783 = vmatprep.subr.bf16.mxu0 %v4322_v41 }
 0x11b   :  { %v619_v54 = vpop.f32.mrf.mxu0 }
 0x11c   :  { %v620_v21 = vadd.f32 %v619_v54, %v568_v42 }
 0x11d   :  { %v621_v35 = vpop.f32.mrf.mxu0 }
 0x11e   :  { %v5142_v55 = vadd.f32 %v621_v35, %v570_v43 }
 0x11f   :  { %v623_v56 = vpop.f32.mrf.mxu0 }
 0x120   :  { %v5221_v56 = vsub.s32 4, %v4942_v38 }
 0x121   :  { %v624_v59 = vpop.f32.mrf.mxu0 }
 0x122   :  { %v5226_v59 = vld [vmem:[%s6094_s5] sm:$0x77] }
 0x123   :  { %v1284_v61 = vrot.slane %v5226_v59, %v5221_v56 }
 0x148   :  { %v911_v37 = vpop.f32.mrf.mxu0 }
 0x149   :  { %v860_v3 = vpop.f32.mrf.mxu1 }
 0x14a   :  { %v861_v7 = vadd.f32 %v860_v3, %v610_v49  ;;  %v913_v8 = vpop.f32.mrf.mxu0 }
 0x14b   :  { %v862_v10 = vpop.f32.mrf.mxu1 }
 0x14c   :  { %v5179_v12 = vadd.f32 %v911_v37, %v861_v7  ;;  %v863_v13 = vadd.f32 %v862_v10, %v612_v15  ;;  %v915_v14 = vpop.f32.mrf.mxu0 }
 0x14d   :  { %v864_v17 = vpop.f32.mrf.mxu1 }
 0x14e   :  { %v5187_v19 = vadd.f32 %v913_v8, %v863_v13  ;;  %v865_v20 = vadd.f32 %v864_v17, %v614_v51  ;;  %v917_v22 = vpop.f32.mrf.mxu0 }
 0x14f   :  { %v866_v24 = vpop.f32.mrf.mxu1 }
 0x150   :  { %v916_v39 = vadd.f32 %v915_v14, %v865_v20  ;;  %v867_v27 = vadd.f32 %v866_v24, %v616_v53  ;;  %v921_v28 = vpop.f32.mrf.mxu0 }
 0x151   :  { %v870_v33 = vpop.f32.mrf.mxu1 }
 0x152   :  { %v918_v6 = vadd.f32 %v917_v22, %v867_v27  ;;  %v871_v34 = vadd.f32 %v870_v33, %v620_v21  ;;  %v923_v58 = vpop.f32.mrf.mxu0 }
 0x153   :  { %v872_v36 = vpop.f32.mrf.mxu1 }
 0x154   :  { %v873_v40 = vadd.f32 %v872_v36, %v5142_v55  ;;  %v922_v42 = vadd.f32 %v921_v28, %v871_v34  ;;  %v925_v43 = vpop.f32.mrf.mxu0  ;;  %v5218_v55 = vsub.s32 0, %v4942_v38 }
 0x155   :  { %v874_v44 = vpop.f32.mrf.mxu1  ;;  %v4325_v43 = vld [vmem:[%s6093_s3 + $0x24] ss:$8 sps:$4 sm:$0xff]  }
 0x156   :  { %v924_v46 = vadd.f32 %v923_v58, %v873_v40  ;;  %v926_v49 = vpop.f32.mrf.mxu0  ;;  %v1280_v60 = vrot.slane %v5226_v59, %v5218_v55  ;;  %v1294_v3 = vrot.slane %v1284_v61, %v5218_v55  ;;  %v4323_v44 = vld [vmem:[%s6093_s3 + $0x20] ss:$8 sps:$4 sm:$0xff]   ;;  %1992 = vmatprep.subr.bf16.mxu1 %v4325_v43  ;;  %v4344_v61 = vld [vmem:[%s6093_s3 + $0x1d0] ss:$8 sps:$4 sm:$0xff]  }
 0x157   :  { %v875_v50 = vpop.f32.mrf.mxu1  ;;  %1993 = vmatpush1.bf16.msra.mxu1 %v4323_v44  ;;  %v4331_v49 = vld [vmem:[%s6093_s3 + $0x14] ss:$8 sps:$4 sm:$0xff]  }
 0x158   :  { %v1252_v15 = vpop.f32.mrf.mxu0  ;;  %v1290_v37 = vrot.slane %v1280_v60, %v5218_v55  ;;  %v4329_v50 = vld [vmem:[%s6093_s3 + $0x10] ss:$8 sps:$4 sm:$0xff]   ;;  %1994 = vmatprep.subr.bf16.mxu1 %v4331_v49  ;;  %v4346_v60 = vld [vmem:[%s6093_s3 + $0x1d4] ss:$8 sps:$4 sm:$0xff]  }
 0x15a   :  { %v1254_v48 = vpop.f32.mrf.mxu0 }
 0x15b   :  { %1995 = vmatpush1.bf16.msra.mxu1 %v4329_v50 }
 0x15c   :  { %v1256_v51 = vpop.f32.mrf.mxu0 }
 0x15e   :  { %v1258_v52 = vpop.f32.mrf.mxu0 }
 0x160   :  { %v1262_v53 = vpop.f32.mrf.mxu0 }
 0x162   :  { %v1264_v54 = vpop.f32.mrf.mxu0 }
 0x164   :  { %v1266_v21 = vpop.f32.mrf.mxu0 }
 0x165   :  { %v4343_v21 = vld [vmem:[%s6093_s3 + $0xf4] ss:$8 sps:$4 sm:$0xff]  }
 0x166   :  { %v1267_v35 = vpop.f32.mrf.mxu0 }
 0x167   :  { %v4341_v35 = vld [vmem:[%s6093_s3 + $0xf0] ss:$8 sps:$4 sm:$0xff]  }
 0x189   :  { %v1201_v62 = vpop.f32.mrf.mxu1 }
 0x18a   :  { %v1253_v63 = vadd.f32 %v1252_v15, %v1201_v62  ;;  %v4334_v15 = vld [vmem:[%s6093_s3 + $0x1f4] ss:$8 sps:$4 sm:$0xff]   ;;  %v5323_v62 = vld [vmem:[%s6090_s1 + $0x4] sm:$0xf] }
 0x18b   :  { %v1203_v1 = vpop.f32.mrf.mxu1 }
 0x18c   :  { %v1269_v26 = vadd.f32 %v1253_v63, %v5179_v12  ;;  %v1255_v2 = vadd.f32 %v1254_v48, %v1203_v1  ;;  %v4332_v48 = vld [vmem:[%s6093_s3 + $0x1f0] ss:$8 sps:$4 sm:$0xff]   ;;  %v4349_v63 = vld [vmem:[%s6093_s3 + $0xe4] ss:$8 sps:$4 sm:$0xff]   ;;  %v4347_v1 = vld [vmem:[%s6093_s3 + $0xe0] ss:$8 sps:$4 sm:$0xff]  }
 0x18d   :  { %v1205_v4 = vpop.f32.mrf.mxu1 }
 0x18e   :  { %v1270_v0 = vadd.f32 %v1255_v2, %v5187_v19  ;;  %v1257_v7 = vadd.f32 %v1256_v51, %v1205_v4  ;;  %v5236_v9 = vadd.f32 %v1290_v37, %v1269_v26  ;;  %v4337_v51 = vld [vmem:[%s6093_s3 + $0x4] ss:$8 sps:$4 sm:$0xff]   ;;  %v4602_v2 = vmov 3   ;;  %v5344_v4 = vld [vmem:[%s6090_s1] sm:$0xf] }
 0x18f   :  { %v1207_v8 = vpop.f32.mrf.mxu1  ;;  %1996 = vmatprep.subr.bf16.mxu1 %v4337_v51  ;;  %v4352_v26 = vld [vmem:[%s6093_s3 + $0x1c4] ss:$8 sps:$4 sm:$0xff]  }
 0x190   :  { %v5238_v10 = vadd.f32 %v1294_v3, %v1270_v0  ;;  %v1271_v11 = vadd.f32 %v1257_v7, %v916_v39  ;;  %v1259_v13 = vadd.f32 %v1258_v52, %v1207_v8  ;;  %v4335_v52 = vld [vmem:[%s6093_s3] ss:$8 sps:$4 sm:$0xff]   ;;  %v4353_v0 = vld [vmem:[%s6093_s3 + $0xd0] ss:$8 sps:$4 sm:$0xff]   ;;  %v4358_v7 = vld [vmem:[%s6093_s3 + $0x1b4] ss:$8 sps:$4 sm:$0xff]  }
 0x191   :  { %v1211_v14 = vpop.f32.mrf.mxu1  ;;  %1997 = vmatpush1.bf16.msra.mxu1 %v4335_v52  ;;  %v4356_v8 = vld [vmem:[%s6093_s3 + $0x1b0] ss:$8 sps:$4 sm:$0xff]  }
 0x192   :  { %v5240_v16 = vadd.f32 %v1290_v37, %v1271_v11  ;;  %v1272_v12 = vadd.f32 %v1259_v13, %v918_v6  ;;  %v1263_v17 = vadd.f32 %v1262_v53, %v1211_v14  ;;  %v1301_v18 = vadd.f32 %v5238_v10, %v5236_v9  ;;  %v4340_v53 = vld [vmem:[%s6093_s3 + $0x1e4] ss:$8 sps:$4 sm:$0xff]   ;;  %1998 = vmatprep.subr.bf16.mxu1 %v4343_v21  ;;  %v4359_v13 = vld [vmem:[%s6093_s3 + $0xc0] ss:$8 sps:$4 sm:$0xff]  }
 0x193   :  { %v1213_v20 = vpop.f32.mrf.mxu1  ;;  %v1314_v39 = vmul.f32 %v5238_v10, %v5238_v10  ;;  %v1313_v6 = vmul.f32 %v5236_v9, %v5236_v9  ;;  %v4361_v11 = vld [vmem:[%s6093_s3 + $0xc4] ss:$8 sps:$4 sm:$0xff]  }
 0x194   :  { %v5244_v22 = vadd.f32 %v1294_v3, %v1272_v12  ;;  %v1273_v19 = vadd.f32 %v1263_v17, %v922_v42  ;;  %v1265_v23 = vadd.f32 %v1264_v54, %v1213_v20  ;;  %1302 = vadd.xlane.f32.xlu1 %v1301_v18  ;;  %v1315_v25 = vmul.f32 %v5240_v16, %v5240_v16  ;;  %v4320_v42 = vld [vmem:[%s6093_s3 + $0x110] ss:$8 sps:$4 sm:$0xff]   ;;  %v4338_v54 = vld [vmem:[%s6093_s3 + $0x1e0] ss:$8 sps:$4 sm:$0xff]   ;;  %v4364_v14 = vld [vmem:[%s6093_s3 + $0x1a4] ss:$8 sps:$4 sm:$0xff]  }
 0x195   :  { %v1215_v24 = vpop.f32.mrf.mxu1  ;;  %v1319_v34 = vadd.f32 %v1314_v39, %v1313_v6  ;;  %1784 = vmatpush1.bf16.msra.mxu0 %v4320_v42  ;;  %1999 = vmatpush2.bf16.msra.mxu1 %v4341_v35  ;;  %v4362_v12 = vld [vmem:[%s6093_s3 + $0x1a0] ss:$8 sps:$4 sm:$0xff]   ;;  %v4367_v17 = vld [vmem:[%s6093_s3 + $0xb4] ss:$8 sps:$4 sm:$0xff]   ;;  %v4365_v18 = vld [vmem:[%s6093_s3 + $0xb0] ss:$8 sps:$4 sm:$0xff]  }
 0x196   :  { %v5250_v27 = vadd.f32 %v1290_v37, %v1273_v19  ;;  %v1274_v28 = vadd.f32 %v1265_v23, %v924_v46  ;;  %v1304_v5 = vadd.f32 %v5244_v22, %v5240_v16  ;;  %v1316_v33 = vmul.f32 %v5244_v22, %v5244_v22  ;;  %v4326_v46 = vld [vmem:[%s6093_s3 + $0x100] ss:$8 sps:$4 sm:$0xff]   ;;  %1785 = vmatprep.subr.bf16.mxu0 %v4328_v45  ;;  %v4370_v19 = vld [vmem:[%s6093_s3 + $0x194] ss:$8 sps:$4 sm:$0xff]   ;;  %v4373_v23 = vld [vmem:[%s6093_s3 + $0xa4] ss:$8 sps:$4 sm:$0xff]  }
 0x197   :  { %v1216_v29 = vpop.f32.mrf.mxu1  ;;  %2000 = vmatprep.subr.bf16.mxu1 %v4349_v63  ;;  %v4350_v37 = vld [vmem:[%s6093_s3 + $0x1c0] ss:$8 sps:$4 sm:$0xff]  }
 0x198   :  { %v5256_v30 = vadd.f32 %v1294_v3, %v1274_v28  ;;  %1305 = vadd.xlane.f32.xlu0 %v1304_v5  ;;  %v1322_v32 = vadd.f32 %v1316_v33, %v1315_v25  ;;  %v1317_v58 = vmul.f32 %v5250_v27, %v5250_v27  ;;  %v4355_v3 = vld [vmem:[%s6093_s3 + $0xd4] ss:$8 sps:$4 sm:$0xff]   ;;  %v5380_v20 = vld [vmem:[%s6090_s1 + $0x8] sm:$0xf]  ;;  %v4376_v25 = vld [vmem:[%s6093_s3 + $0x184] ss:$8 sps:$4 sm:$0xff]  }
 0x199   :  { %1786 = vmatpush1.bf16.msra.mxu0 %v4326_v46  ;;  %2001 = vmatpush2.bf16.msra.mxu1 %v4347_v1  ;;  %v4371_v24 = vld [vmem:[%s6093_s3 + $0xa0] ss:$8 sps:$4 sm:$0xff]   ;;  %v4379_v28 = vld [vmem:[%s6093_s3 + $0x94] ss:$8 sps:$4 sm:$0xff]   ;;  %v4377_v5 = vld [vmem:[%s6093_s3 + $0x90] ss:$8 sps:$4 sm:$0xff]  }
 0x19a   :  { %1323 = vadd.xlane.f32.xlu1 %v1322_v32  ;;  %v1318_v31 = vmul.f32 %v5256_v30, %v5256_v30  ;;  %v1307_v40 = vadd.f32 %v5256_v30, %v5250_v27  ;;  %1787 = vmatprep.subr.bf16.mxu0 %v4334_v15  ;;  %v4374_v39 = vld [vmem:[%s6093_s3 + $0x180] ss:$8 sps:$4 sm:$0xff]   ;;  %v4382_v33 = vld [vmem:[%s6093_s3 + $0x274] ss:$8 sps:$4 sm:$0xff]   ;;  %v4385_v29 = vld [vmem:[%s6093_s3 + $0x84] ss:$8 sps:$4 sm:$0xff]  }
 0x19b   :  { %2002 = vmatprep.subr.bf16.mxu1 %v4355_v3  ;;  %v4383_v32 = vld [vmem:[%s6093_s3 + $0x80] ss:$8 sps:$4 sm:$0xff]   ;;  %v5424_v1 = vsub.s32 2, %v4942_v38 }
 0x19c   :  { %1320 = vadd.xlane.f32.xlu0 %v1319_v34  ;;  %v1325_v36 = vadd.f32 %v1318_v31, %v1317_v58 }
 0x19d   :  { %1788 = vmatpush2.bf16.msra.mxu0 %v4332_v48  ;;  %2003 = vmatpush2.bf16.msra.mxu1 %v4353_v0 }
 0x19e   :  { %1326 = vadd.xlane.f32.xlu1 %v1325_v36  ;;  %1789 = vmatprep.subr.bf16.mxu0 %v4340_v53 }
 0x19f   :  { %2004 = vmatprep.subr.bf16.mxu1 %v4361_v11 }
 0x1a0   :  { %1308 = vadd.xlane.f32.xlu0 %v1307_v40 }
 0x1a1   :  { %1790 = vmatpush2.bf16.msra.mxu0 %v4338_v54  ;;  %2005 = vmatpush2.bf16.msra.mxu1 %v4359_v13 }
 0x1a2   :  { %1791 = vmatprep.subr.bf16.mxu0 %v4346_v60  ;;  %2006 = vmatprep.subr.bf16.mxu1 %v4367_v17  ;;  %v5418_v60 = vsub.s32 1, %v4942_v38 }
 0x1a5   :  { %1792 = vmatpush2.bf16.msra.mxu0 %v4344_v61  ;;  %2007 = vmatpush2.bf16.msra.mxu1 %v4365_v18  ;;  %v5421_v61 = vsub.s32 5, %v4942_v38 }
 0x1a6   :  { %1793 = vmatprep.subr.bf16.mxu0 %v4352_v26  ;;  %2008 = vmatprep.subr.bf16.mxu1 %v4373_v23  ;;  %v5427_v26 = vsub.s32 6, %v4942_v38 }
 0x1a7   :  { %v1365_v3 = vrot.slane %v5226_v59, %v5421_v61 }
 0x1a9   :  { %1794 = vmatpush2.bf16.msra.mxu0 %v4350_v37  ;;  %2009 = vmatpush2.bf16.msra.mxu1 %v4371_v24 }
 0x1aa   :  { %1795 = vmatprep.subr.bf16.mxu0 %v4358_v7  ;;  %2010 = vmatprep.subr.bf16.mxu1 %v4379_v28  ;;  %v1385_v7 = vrot.slane %v5226_v59, %v5424_v1 }
 0x1ac   :  { %v1395_v17 = vrot.slane %v1385_v7, %v5424_v1 }
 0x1ad   :  { %1796 = vmatpush2.bf16.msra.mxu0 %v4356_v8  ;;  %2011 = vmatpush2.bf16.msra.mxu1 %v4377_v5  ;;  %v1389_v8 = vrot.slane %v5226_v59, %v5427_v26 }
 0x1ae   :  { %1797 = vmatprep.subr.bf16.mxu0 %v4364_v14  ;;  %2012 = vmatprep.subr.bf16.mxu1 %v4385_v29  ;;  %v1375_v14 = vrot.slane %v1365_v3, %v5418_v60 }
 0x1af   :  { %1448 = vperm.xlu1 %4099, %v5323_v62   ;;  %v1399_v18 = vrot.slane %v1389_v8, %v5424_v1 }
 0x1b1   :  { %1798 = vmatpush2.bf16.msra.mxu0 %v4362_v12  ;;  %2013 = vmatpush2.bf16.msra.mxu1 %v4383_v32 }
 0x1b2   :  { %1799 = vmatprep.subr.bf16.mxu0 %v4370_v19 }
 0x1b3   :  { %4100 = vset.pattern.permute.xlu1 %v4602_v2 }
 0x1b4   :  { %1500 = vperm.xlu1 %4100, %v5344_v4  }
 0x1b6   :  { %1437 = vperm.xlu0 %4098, %v5344_v4  }
 0x1b8   :  { %1511 = vperm.xlu1 %4100, %v5323_v62  }
 0x1bc   :  { %4101 = vset.pattern.permute.xlu1 %v4601_v57  ;;  %v4368_v57 = vld [vmem:[%s6093_s3 + $0x190] ss:$8 sps:$4 sm:$0xff]  }
 0x1bd   :  { %1459 = vperm.xlu1 %4101, %v5380_v20   ;;  %1800 = vmatpush2.bf16.msra.mxu0 %v4368_v57 }
 0x1be   :  { %1801 = vmatprep.subr.bf16.mxu0 %v4376_v25 }
 0x1c1   :  { %4102 = vset.pattern.permute.xlu1 %v4602_v2  ;;  %1802 = vmatpush2.bf16.msra.mxu0 %v4374_v39  ;;  %v1361_v2 = vrot.slane %v5226_v59, %v5418_v60 }
 0x1c2   :  { %1522 = vperm.xlu1 %4102, %v5380_v20   ;;  %2226 = vmatprep.subr.bf16.mxu0 %v4382_v33 }
 0x1c3   :  { %v1371_v13 = vrot.slane %v1361_v2, %v5418_v60 }
 0x21d   :  { %v1303_v6 = vpop.xlane.xlu1 %1302 }
 0x21e   :  { %v1310_v58 = vmul.f32 0.006666667, %v1303_v6 }
 0x220   :  { %v1331_v45 = vmul.f32 %v1310_v58, %v1310_v58  ;;  %v1340_v19 = vsub.f32 %v5236_v9, %v1310_v58  ;;  %v1341_v57 = vsub.f32 %v5238_v10, %v1310_v58 }
 0x221   :  { %v1306_v34 = vpop.xlane.xlu0 %1305 }
 0x222   :  { %v1311_v31 = vmul.f32 0.006666667, %v1306_v34 }
 0x223   :  { %v1324_v36 = vpop.xlane.xlu1 %1323 }
 0x224   :  { %v1332_v41 = vmul.f32 %v1311_v31, %v1311_v31  ;;  %v1329_v40 = vmul.f32 0.006666667, %v1324_v36  ;;  %v1342_v11 = vsub.f32 %v5240_v16, %v1311_v31  ;;  %v1343_v38 = vsub.f32 %v5244_v22, %v1311_v31 }
 0x225   :  { %v1321_v42 = vpop.xlane.xlu0 %1320 }
 0x226   :  { %v1335_v43 = vsub.f32 %v1329_v40, %v1332_v41  ;;  %v1328_v44 = vmul.f32 0.006666667, %v1321_v42 }
 0x227   :  { %v1327_v50 = vpop.xlane.xlu1 %1326 }
 0x228   :  { %v1338_v46 = vmax.f32 %v1335_v43, 0.0  ;;  %v1334_v49 = vsub.f32 %v1328_v44, %v1331_v45  ;;  %v1330_v54 = vmul.f32 0.006666667, %v1327_v50 }
 0x229   :  { %v1309_v15 = vpop.xlane.xlu0 %1308 }
 0x22a   :  { %v1347_v48 = vadd.f32 1e-05, %v1338_v46  ;;  %v1337_v51 = vmax.f32 %v1334_v49, 0.0  ;;  %v1312_v52 = vmul.f32 0.006666667, %v1309_v15 }
 0x22b   :  { %v1449_v0 = vpop.permute.xlu1 %1448 }
 0x22c   :  { %4575 = vrsqrt.f32 %v1347_v48  ;;  %v1346_v53 = vadd.f32 1e-05, %v1337_v51  ;;  %v1333_v21 = vmul.f32 %v1312_v52, %v1312_v52  ;;  %v1344_v34 = vsub.f32 %v5250_v27, %v1312_v52  ;;  %v4380_v51 = vld [vmem:[%s6093_s3 + $0x270] ss:$8 sps:$4 sm:$0xff]  }
 0x22d   :  { %v1345_v9 = vsub.f32 %v5256_v30, %v1312_v52  ;;  %v1457_v42 = vrot.slane %v1449_v0, %v4955_v47 }
 0x22e   :  { %4577 = vrsqrt.f32 %v1346_v53  ;;  %v1336_v35 = vsub.f32 %v1330_v54, %v1333_v21  ;;  %v4388_v54 = vld [vmem:[%s6093_s3 + $0x264] ss:$8 sps:$4 sm:$0xff]  }
 0x22f   :  { %v5445_v24 = vpop.permute.xlu1 %1500 }
 0x230   :  { %v1339_v63 = vmax.f32 %v1336_v35, 0.0 }
 0x231   :  { %v1438_v5 = vpop.permute.xlu0 %1437 }
 0x232   :  { %v1348_v37 = vadd.f32 1e-05, %v1339_v63  ;;  %v1446_v43 = vrot.slane %v1438_v5, %v4955_v47 }
 0x233   :  { %v1512_v31 = vpop.permute.xlu1 %1511 }
 0x234   :  { %4579 = vrsqrt.f32 %v1348_v37  ;;  %v3739_v52 = vcombine.low %v1446_v43, %v1457_v42  ;;  %v4401_v42 = vld [vmem:[%s6093_s3 + $0x210] ss:$8 sps:$4 sm:$0xff]   ;;  %v4406_v43 = vld [vmem:[%s6093_s3 + $0x204] ss:$8 sps:$4 sm:$0xff]  }
 0x238   :  { %v1460_v37 = vpop.permute.xlu1 %1459 }
 0x239   :  { %v4576_v12 = vpop.eup %4575  ;;  %v1468_v3 = vrot.slane %v1460_v37, %v4955_v47  ;;  %v4425_v37 = vld [vmem:[%s6093_s3 + $0x290] ss:$8 sps:$4 sm:$0xff]  }
 0x23a   :  { %v1354_v23 = vmul.f32 %v4576_v12, %v1342_v11  ;;  %v1355_v59 = vmul.f32 %v4576_v12, %v1343_v38  ;;  %v4386_v11 = vld [vmem:[%s6093_s3 + $0x260] ss:$8 sps:$4 sm:$0xff]   ;;  %v1509_v38 = vrot.slane %v5445_v24, %v4955_v47 }
 0x23b   :  { %v4578_v16 = vpop.eup %4577 }
 0x23c   :  { %v1352_v25 = vmul.f32 %v4578_v16, %v1340_v19  ;;  %v1378_v22 = vmul.f32 %v1371_v13, %v1354_v23  ;;  %v1353_v39 = vmul.f32 %v4578_v16, %v1341_v57  ;;  %v1379_v28 = vmul.f32 %v1375_v14, %v1355_v59  ;;  %v4391_v23 = vld [vmem:[%s6093_s3 + $0x254] ss:$8 sps:$4 sm:$0xff]  }
 0x23d   :  { %v3740_v59 = vcombine.low %v1468_v3, %v1468_v3 }
 0x23e   :  { %v1376_v33 = vmul.f32 %v1371_v13, %v1352_v25  ;;  %v1402_v29 = vadd.f32 %v1395_v17, %v1378_v22  ;;  %v1377_v32 = vmul.f32 %v1375_v14, %v1353_v39  ;;  %v1403_v6 = vadd.f32 %v1399_v18, %v1379_v28  ;;  %v4389_v22 = vld [vmem:[%s6093_s3 + $0x250] ss:$8 sps:$4 sm:$0xff]   ;;  %v4394_v28 = vld [vmem:[%s6093_s3 + $0x244] ss:$8 sps:$4 sm:$0xff]  }
 0x240   :  { %v1400_v10 = vadd.f32 %v1395_v17, %v1376_v33  ;;  %v1408_v58 = vmax.f32 %v1402_v29, 0.0  ;;  %v1401_v36 = vadd.f32 %v1399_v18, %v1377_v32  ;;  %v1409_v41 = vmax.f32 %v1403_v6, 0.0 }
 0x241   :  { %v4580_v40 = vpop.eup %4579 }
 0x242   :  { %v1356_v44 = vmul.f32 %v4580_v40, %v1344_v34  ;;  %v1357_v45 = vmul.f32 %v4580_v40, %v1345_v9  ;;  %v1406_v46 = vmax.f32 %v1400_v10, 0.0  ;;  %v1407_v49 = vmax.f32 %v1401_v36, 0.0  ;;  %v4392_v34 = vld [vmem:[%s6093_s3 + $0x240] ss:$8 sps:$4 sm:$0xff]   ;;  %v4400_v36 = vld [vmem:[%s6093_s3 + $0x224] ss:$8 sps:$4 sm:$0xff]  }
 0x243   :  { %v4079_v50 = vpack.c.bf16 %v1409_v41, %v1408_v58  ;;  %v4403_v40 = vld [vmem:[%s6093_s3 + $0x214] ss:$8 sps:$4 sm:$0xff]  }
 0x244   :  { %v1380_v15 = vmul.f32 %v1371_v13, %v1356_v44  ;;  %v1381_v48 = vmul.f32 %v1375_v14, %v1357_v45  ;;  %v5451_v27 = vpack.c.bf16 %v1408_v58, %v1406_v46  ;;  %v1413_v30 = vpack.c.bf16 %v1409_v41, %v1407_v49  ;;  %v4395_v58 = vld [vmem:[%s6093_s3 + $0x230] ss:$8 sps:$4 sm:$0xff]   ;;  %v4398_v41 = vld [vmem:[%s6093_s3 + $0x220] ss:$8 sps:$4 sm:$0xff]   ;;  %v4409_v45 = vld [vmem:[%s6093_s3 + $0x2f4] ss:$8 sps:$4 sm:$0xff]  }
 0x245   :  { %v4078_v53 = vpack.c.bf16 %v1407_v49, %v1406_v46  ;;  %3478 = vst [vmem:[%s6095_s6 + $0x8] sm:$0xff] %v4079_v50  ;;  %v1520_v13 = vrot.slane %v1512_v31, %v4955_v47  ;;  %v4397_v31 = vld [vmem:[%s6093_s3 + $0x234] ss:$8 sps:$4 sm:$0xff]   ;;  %v4404_v44 = vld [vmem:[%s6093_s3 + $0x200] ss:$8 sps:$4 sm:$0xff]  }
 0x246   :  { %v1404_v21 = vadd.f32 %v1395_v17, %v1380_v15  ;;  %v1405_v35 = vadd.f32 %v1399_v18, %v1381_v48  ;;  %v1420_v63 = vrot.slane %v5451_v27, 7  ;;  %1803 = vmatprep.mubr.bf16.mxu0 %v1413_v30  ;;  %v1421_v2 = vrot.slane %v1413_v30, 7  ;;  %v4407_v46 = vld [vmem:[%s6093_s3 + $0x2f0] ss:$8 sps:$4 sm:$0xff]   ;;  %v4412_v49 = vld [vmem:[%s6093_s3 + $0x2e4] ss:$8 sps:$4 sm:$0xff]  }
 0x247   :  { %3477 = vst [vmem:[%s6095_s6] sm:$0xff] %v4078_v53  ;;  %1804 = vmatmul.mubr.bf16.vlgmr.msra.gmra.mxu0 %v5451_v27  ;;  %v5492_v39 = vcombine.low %v1509_v38, %v1520_v13  ;;  %v1487_v5 = vrot.slane %v1413_v30, 1  ;;  %v4410_v50 = vld [vmem:[%s6093_s3 + $0x2e0] ss:$8 sps:$4 sm:$0xff]   ;;  %v4415_v15 = vld [vmem:[%s6093_s3 + $0x2d4] ss:$8 sps:$4 sm:$0xff]  }
 0x248   :  { %v1410_v0 = vmax.f32 %v1404_v21, 0.0  ;;  %v1411_v7 = vmax.f32 %v1405_v35, 0.0  ;;  %v1431_v8 = vsel %vm109_vm3, 0, %v1420_v63  ;;  %2227 = vmatpush1.bf16.msra.mxu0 %v4380_v51  ;;  %v1434_v12 = vsel %vm109_vm3, 0, %v1421_v2  ;;  %v4413_v48 = vld [vmem:[%s6093_s3 + $0x2d0] ss:$8 sps:$4 sm:$0xff]  }
 0x249   :  { %v1479_v14 = vmul.bf16 %v3739_v52, %v1431_v8  ;;  %2228 = vmatprep.subr.bf16.mxu0 %v4388_v54  ;;  %v1480_v57 = vmul.bf16 %v3739_v52, %v1434_v12  ;;  %v4418_v30 = vld [vmem:[%s6093_s3 + $0x2c4] ss:$8 sps:$4 sm:$0xff]   ;;  %v4416_v51 = vld [vmem:[%s6093_s3 + $0x2c0] ss:$8 sps:$4 sm:$0xff]   ;;  %v4421_v52 = vld [vmem:[%s6093_s3 + $0x2b4] ss:$8 sps:$4 sm:$0xff]  }
 0x24a   :  { %v4080_v17 = vpack.c.bf16 %v1411_v7, %v1410_v0  ;;  %v5476_v18 = vpack.c.bf16 %v1410_v0, %v1410_v0  ;;  %v5478_v19 = vpack.c.bf16 %v1411_v7, %v1411_v7  ;;  %v4419_v53 = vld [vmem:[%s6093_s3 + $0x2b0] ss:$8 sps:$4 sm:$0xff]   ;;  %v4424_v54 = vld [vmem:[%s6093_s3 + $0x2a4] ss:$8 sps:$4 sm:$0xff]   ;;  %v4422_v21 = vld [vmem:[%s6093_s3 + $0x2a0] ss:$8 sps:$4 sm:$0xff]  }
 0x24b   :  { %2014 = vmatprep.mubr.bf16.mxu1 %v1480_v57  ;;  %v4427_v35 = vld [vmem:[%s6093_s3 + $0x294] ss:$8 sps:$4 sm:$0xff]   ;;  %v1484_v7 = vrot.slane %v5451_v27, 1  ;;  %v4428_v8 = vld [vmem:[%s6093_s3 + $0x280] ss:$8 sps:$4 sm:$0xff]  }
 0x24c   :  { %3479 = vst [vmem:[%s6095_s6 + $0x10] sm:$0xff] %v4080_v17  ;;  %v1422_v24 = vrot.slane %v5476_v18, 7  ;;  %v1424_v16 = vrot.slane %v5478_v19, 7  ;;  %v1488_v25 = vrot.slane %v5478_v19, 1  ;;  %2229 = vmatpush1.bf16.msra.mxu0 %v4386_v11  ;;  %1813 = vmatprep.mubr.bf16.mxu0 %v5478_v19  ;;  %v1485_v3 = vrot.slane %v5476_v18, 1 }
 0x24d   :  { %2015 = vmatmul.mubr.bf16.vlgmr.msra.gmra.mxu1 %v1479_v14  ;;  %2230 = vmatprep.subr.bf16.mxu0 %v4391_v23  ;;  %v4431_v19 = vld [vmem:[%s6096_s4 + $0x170] ss:$8 sps:$4 sm:$0xff]   ;;  %v4433_v57 = vld [vmem:[%s6096_s4 + $0x174] ss:$8 sps:$4 sm:$0xff]   ;;  %v4436_v23 = vld [vmem:[%s6096_s4 + $0x164] ss:$8 sps:$4 sm:$0xff]  }
 0x24e   :  { %v1425_v33 = vsel %vm109_vm3, %v1421_v2, %v1424_v16  ;;  %v1423_v32 = vsel %vm109_vm3, %v1420_v63, %v1422_v24  ;;  %v1489_v6 = vsel %vm1483_vm9, %v1487_v5, %v1488_v25  ;;  %v1523_v63 = vpop.permute.xlu1 %1522  ;;  %v4430_v2 = vld [vmem:[%s6093_s3 + $0x284] ss:$8 sps:$4 sm:$0xff]   ;;  %v1486_v38 = vsel %vm1483_vm9, %v1484_v7, %v1485_v3  ;;  %2811 = vmatprep.subr.bf16.mxu1 %v4433_v57  ;;  %v4439_v24 = vld [vmem:[%s6096_s4 + $0x154] ss:$8 sps:$4 sm:$0xff]   ;;  %v4440_v16 = vld [vmem:[%s6096_s4 + $0x70] ss:$8 sps:$4 sm:$0xff]  }
 0x24f   :  { %v1482_v29 = vmul.bf16 %v3740_v59, %v1425_v33  ;;  %1814 = vmatmul.mubr.bf16.gmra.mxu0 %v5476_v18  ;;  %v1543_v9 = vmul.bf16 %v5492_v39, %v1489_v6  ;;  %v1481_v10 = vmul.bf16 %v3740_v59, %v1423_v32  ;;  %v1531_v0 = vrot.slane %v1523_v63, %v4955_v47  ;;  %v4434_v59 = vld [vmem:[%s6096_s4 + $0x160] ss:$8 sps:$4 sm:$0xff]   ;;  %v4454_v6 = vld [vmem:[%s6096_s4 + $0x54] ss:$8 sps:$4 sm:$0xff]  }
 0x250   :  { %2231 = vmatpush1.bf16.msra.mxu0 %v4389_v22  ;;  %v1497_v13 = vsel %vm1492_vm10, %v1488_v25, 0  ;;  %v1542_v14 = vmul.bf16 %v5492_v39, %v1486_v38  ;;  %v1494_v27 = vsel %vm1492_vm10, %v1485_v3, 0  ;;  %v4603_v18 = vmov 4   ;;  %2812 = vmatpush1.bf16.msra.mxu1 %v4431_v19  ;;  %v4442_v25 = vld [vmem:[%s6096_s4 + $0x74] ss:$8 sps:$4 sm:$0xff]  }
 0x251   :  { %2024 = vmatprep.mubr.bf16.mxu1 %v1482_v29  ;;  %2232 = vmatprep.subr.bf16.mxu0 %v4394_v28  ;;  %v3742_v11 = vcombine.low %v1531_v0, %v1531_v0  ;;  %v4437_v39 = vld [vmem:[%s6096_s4 + $0x150] ss:$8 sps:$4 sm:$0xff]   ;;  %v4448_v28 = vld [vmem:[%s6096_s4 + $0x64] ss:$8 sps:$4 sm:$0xff]   ;;  %v4446_v33 = vld [vmem:[%s6096_s4 + $0x60] ss:$8 sps:$4 sm:$0xff]  }
 0x252   :  { %2258 = vmatprep.mubr.bf16.mxu0 %v1543_v9  ;;  %4104 = vset.pattern.permute.xlu1 %v4603_v18  ;;  %v4445_v29 = vld [vmem:[%s6096_s4 + $0x144] ss:$8 sps:$4 sm:$0xff]   ;;  %v4451_v9 = vld [vmem:[%s6096_s4 + $0x134] ss:$8 sps:$4 sm:$0xff]  }
 0x253   :  { %v1545_v12 = vmul.bf16 %v3742_v11, %v1497_v13  ;;  %v1544_v17 = vmul.bf16 %v3742_v11, %v1494_v27  ;;  %4103 = vset.pattern.permute.xlu0 %v4603_v18  ;;  %2813 = vmatprep.subr.bf16.mxu1 %v4436_v23 }
 0x254   :  { %2233 = vmatpush1.bf16.msra.mxu0 %v4392_v34  ;;  %2814 = vmatpush1.bf16.msra.mxu1 %v4434_v59  ;;  %v4443_v34 = vld [vmem:[%s6096_s4 + $0x140] ss:$8 sps:$4 sm:$0xff]  }
 0x255   :  { %2025 = vmatmul.mubr.bf16.gmra.mxu1 %v1481_v10  ;;  %2234 = vmatprep.subr.bf16.mxu0 %v4397_v31 }
 0x256   :  { %2815 = vmatprep.subr.bf16.mxu1 %v4439_v24 }
 0x258   :  { %2235 = vmatpush1.bf16.msra.mxu0 %v4395_v58  ;;  %2816 = vmatpush1.bf16.msra.mxu1 %v4437_v39  ;;  %v4452_v58 = vld [vmem:[%s6096_s4 + $0x50] ss:$8 sps:$4 sm:$0xff]  }
 0x259   :  { %2236 = vmatprep.subr.bf16.mxu0 %v4400_v36  ;;  %2817 = vmatprep.subr.bf16.mxu1 %v4445_v29  ;;  %v4460_v36 = vld [vmem:[%s6096_s4 + $0x44] ss:$8 sps:$4 sm:$0xff]  }
 0x25c   :  { %2237 = vmatpush1.bf16.msra.mxu0 %v4398_v41  ;;  %2818 = vmatpush1.bf16.msra.mxu1 %v4443_v34 }
 0x25d   :  { %2238 = vmatprep.subr.bf16.mxu0 %v4403_v40  ;;  %2819 = vmatprep.subr.bf16.mxu1 %v4451_v9 }
 0x260   :  { %2239 = vmatpush1.bf16.msra.mxu0 %v4401_v42  ;;  %v4449_v42 = vld [vmem:[%s6096_s4 + $0x130] ss:$8 sps:$4 sm:$0xff]  }
 0x261   :  { %2240 = vmatprep.subr.bf16.mxu0 %v4406_v43  ;;  %v4458_v43 = vld [vmem:[%s6096_s4 + $0x40] ss:$8 sps:$4 sm:$0xff]   ;;  %2820 = vmatpush1.bf16.msra.mxu1 %v4449_v42 }
 0x264   :  { %2241 = vmatpush1.bf16.msra.mxu0 %v4404_v44  ;;  %v4457_v44 = vld [vmem:[%s6096_s4 + $0x124] ss:$8 sps:$4 sm:$0xff]  }
 0x265   :  { %2242 = vmatprep.subr.bf16.mxu0 %v4409_v45  ;;  %2821 = vmatprep.subr.bf16.mxu1 %v4457_v44  ;;  %v4463_v44 = vld [vmem:[%s6096_s4 + $0x114] ss:$8 sps:$4 sm:$0xff]  }
 0x268   :  { %2243 = vmatpush2.bf16.msra.mxu0 %v4407_v46 }
 0x269   :  { %2244 = vmatprep.subr.bf16.mxu0 %v4412_v49 }
 0x26c   :  { %2245 = vmatpush2.bf16.msra.mxu0 %v4410_v50 }
 0x26d   :  { %2246 = vmatprep.subr.bf16.mxu0 %v4415_v15  ;;  %v4455_v15 = vld [vmem:[%s6096_s4 + $0x120] ss:$8 sps:$4 sm:$0xff]  }
 0x26e   :  { %2822 = vmatpush1.bf16.msra.mxu1 %v4455_v15  ;;  %v4469_v15 = vld [vmem:[%s6096_s4 + $0x104] ss:$8 sps:$4 sm:$0xff]  }
 0x26f   :  { %2823 = vmatprep.subr.bf16.mxu1 %v4463_v44 }
 0x270   :  { %2247 = vmatpush2.bf16.msra.mxu0 %v4413_v48 }
 0x271   :  { %2248 = vmatprep.subr.bf16.mxu0 %v4418_v30 }
 0x274   :  { %2249 = vmatpush2.bf16.msra.mxu0 %v4416_v51 }
 0x275   :  { %2250 = vmatprep.subr.bf16.mxu0 %v4421_v52 }
 0x278   :  { %2251 = vmatpush2.bf16.msra.mxu0 %v4419_v53 }
 0x279   :  { %2252 = vmatprep.subr.bf16.mxu0 %v4424_v54  ;;  %v5654_v54 = vld [vmem:[%s6094_s5 + $0x8] sm:$0x77] }
 0x27c   :  { %2253 = vmatpush2.bf16.msra.mxu0 %v4422_v21  ;;  %v2289_v21 = vrot.slane %v5654_v54, %v5218_v55 }
 0x27d   :  { %2254 = vmatprep.subr.bf16.mxu0 %v4427_v35  ;;  %v2293_v35 = vrot.slane %v5654_v54, %v5221_v56 }
 0x27e   :  { %v2299_v0 = vrot.slane %v2289_v21, %v5218_v55  ;;  %v4478_v21 = vld [vmem:[%s6096_s4 + $0x14] ss:$8 sps:$4 sm:$0xff]  }
 0x27f   :  { %v2303_v7 = vrot.slane %v2293_v35, %v5218_v55  ;;  %v4476_v35 = vld [vmem:[%s6096_s4 + $0x10] ss:$8 sps:$4 sm:$0xff]  }
 0x280   :  { %2255 = vmatpush2.bf16.msra.mxu0 %v4425_v37 }
 0x281   :  { %2256 = vmatprep.subr.bf16.mxu0 %v4430_v2 }
 0x284   :  { %2257 = vmatpush2.bf16.msra.mxu0 %v4428_v8 }
 0x285   :  { %3022 = vmatprep.subr.bf16.mxu0 %v4442_v25 }
 0x287   :  { %2259 = vmatmul.mubr.bf16.vlgmr.msra.gmra.mxu0 %v1542_v14 }
 0x288   :  { %2268 = vmatprep.mubr.bf16.mxu0 %v1545_v12  ;;  %3023 = vmatpush1.bf16.msra.mxu0 %v4440_v16 }
 0x289   :  { %3024 = vmatprep.subr.bf16.mxu0 %v4448_v28 }
 0x28c   :  { %3025 = vmatpush1.bf16.msra.mxu0 %v4446_v33 }
 0x28d   :  { %3026 = vmatprep.subr.bf16.mxu0 %v4454_v6 }
 0x28f   :  { %2269 = vmatmul.mubr.bf16.gmra.mxu0 %v1544_v17 }
 0x290   :  { %3027 = vmatpush1.bf16.msra.mxu0 %v4452_v58 }
 0x291   :  { %3028 = vmatprep.subr.bf16.mxu0 %v4460_v36 }
 0x294   :  { %3029 = vmatpush1.bf16.msra.mxu0 %v4458_v43 }
 0x307   :  { %v1805_v22 = vpop.f32.mrf.mxu0 }
 0x309   :  { %v1807_v5 = vpop.f32.mrf.mxu0 }
 0x30b   :  { %v1809_v32 = vpop.f32.mrf.mxu0 }
 0x30d   :  { %v2016_v31 = vpop.f32.mrf.mxu1  ;;  %v1811_v10 = vpop.f32.mrf.mxu0 }
 0x30e   :  { %v2017_v63 = vadd.f32 %v2016_v31, %v1805_v22 }
 0x30f   :  { %v2018_v41 = vpop.f32.mrf.mxu1  ;;  %v1815_v40 = vpop.f32.mrf.mxu0 }
 0x310   :  { %v2019_v2 = vadd.f32 %v2018_v41, %v1807_v5 }
 0x311   :  { %v2020_v45 = vpop.f32.mrf.mxu1  ;;  %v1817_v46 = vpop.f32.mrf.mxu0 }
 0x312   :  { %v2021_v11 = vadd.f32 %v2020_v45, %v1809_v32 }
 0x313   :  { %v2022_v49 = vpop.f32.mrf.mxu1  ;;  %v1819_v50 = vpop.f32.mrf.mxu0 }
 0x314   :  { %v2023_v14 = vadd.f32 %v2022_v49, %v1811_v10  ;;  %v4466_v49 = vld [vmem:[%s6096_s4 + $0x34] ss:$8 sps:$4 sm:$0xff]   ;;  %v4464_v50 = vld [vmem:[%s6096_s4 + $0x30] ss:$8 sps:$4 sm:$0xff]  }
 0x315   :  { %v2026_v48 = vpop.f32.mrf.mxu1  ;;  %v1820_v30 = vpop.f32.mrf.mxu0  ;;  %3030 = vmatprep.subr.bf16.mxu0 %v4466_v49 }
 0x316   :  { %v2027_v57 = vadd.f32 %v2026_v48, %v1815_v40  ;;  %3031 = vmatpush1.bf16.msra.mxu0 %v4464_v50  ;;  %v4467_v48 = vld [vmem:[%s6096_s4 + $0x100] ss:$8 sps:$4 sm:$0xff]   ;;  %v4472_v30 = vld [vmem:[%s6096_s4 + $0x24] ss:$8 sps:$4 sm:$0xff]  }
 0x317   :  { %v2028_v51 = vpop.f32.mrf.mxu1  ;;  %3032 = vmatprep.subr.bf16.mxu0 %v4472_v30 }
 0x318   :  { %v2029_v16 = vadd.f32 %v2028_v51, %v1817_v46  ;;  %v4461_v46 = vld [vmem:[%s6096_s4 + $0x110] ss:$8 sps:$4 sm:$0xff]   ;;  %v4470_v51 = vld [vmem:[%s6096_s4 + $0x20] ss:$8 sps:$4 sm:$0xff]  }
 0x319   :  { %v2030_v52 = vpop.f32.mrf.mxu1  ;;  %2824 = vmatpush1.bf16.msra.mxu1 %v4461_v46 }
 0x31a   :  { %2825 = vmatprep.subr.bf16.mxu1 %v4469_v15  ;;  %v4475_v52 = vld [vmem:[%s6096_s4 + $0x1f4] ss:$8 sps:$4 sm:$0xff]   ;;  %3033 = vmatpush1.bf16.msra.mxu0 %v4470_v51 }
 0x31b   :  { %v2031_v53 = vpop.f32.mrf.mxu1  ;;  %3034 = vmatprep.subr.bf16.mxu0 %v4478_v21 }
 0x31c   :  { %v4473_v53 = vld [vmem:[%s6096_s4 + $0x1f0] ss:$8 sps:$4 sm:$0xff]  }
 0x31d   :  { %2826 = vmatpush1.bf16.msra.mxu1 %v4467_v48 }
 0x31e   :  { %2827 = vmatprep.subr.bf16.mxu1 %v4475_v52  ;;  %3035 = vmatpush1.bf16.msra.mxu0 %v4476_v35 }
 0x321   :  { %2828 = vmatpush2.bf16.msra.mxu1 %v4473_v53 }
 0x347   :  { %v2260_v37 = vpop.f32.mrf.mxu0 }
 0x348   :  { %v2277_v3 = vadd.f32 %v2260_v37, %v2017_v63  ;;  %v4481_v63 = vld [vmem:[%s6096_s4 + $0x1e4] ss:$8 sps:$4 sm:$0xff]   ;;  %v4479_v37 = vld [vmem:[%s6096_s4 + $0x1e0] ss:$8 sps:$4 sm:$0xff]  }
 0x349   :  { %v2262_v8 = vpop.f32.mrf.mxu0  ;;  %2829 = vmatprep.subr.bf16.mxu1 %v4481_v63 }
 0x34a   :  { %v2278_v38 = vadd.f32 %v2262_v8, %v2019_v2  ;;  %v5662_v12 = vadd.f32 %v2299_v0, %v2277_v3  ;;  %v4484_v2 = vld [vmem:[%s6096_s4 + $0x4] ss:$8 sps:$4 sm:$0xff]   ;;  %2830 = vmatpush2.bf16.msra.mxu1 %v4479_v37  ;;  %v4482_v3 = vld [vmem:[%s6096_s4] ss:$8 sps:$4 sm:$0xff]   ;;  %v4490_v8 = vld [vmem:[%s6096_s4 + $0xf4] ss:$8 sps:$4 sm:$0xff]  }
 0x34b   :  { %v2264_v13 = vpop.f32.mrf.mxu0  ;;  %3036 = vmatprep.subr.bf16.mxu0 %v4484_v2 }
 0x34c   :  { %v5664_v27 = vadd.f32 %v2303_v7, %v2278_v38  ;;  %v2279_v17 = vadd.f32 %v2264_v13, %v2021_v11  ;;  %v2322_v5 = vmul.f32 %v5662_v12, %v5662_v12  ;;  %3037 = vmatpush1.bf16.msra.mxu0 %v4482_v3  ;;  %v4488_v11 = vld [vmem:[%s6096_s4 + $0xf0] ss:$8 sps:$4 sm:$0xff]   ;;  %v4493_v38 = vld [vmem:[%s6096_s4 + $0x1c4] ss:$8 sps:$4 sm:$0xff]   ;;  %v4491_v13 = vld [vmem:[%s6096_s4 + $0x1c0] ss:$8 sps:$4 sm:$0xff]  }
 0x34d   :  { %v2266_v19 = vpop.f32.mrf.mxu0  ;;  %3038 = vmatprep.subr.bf16.mxu0 %v4490_v8 }
 0x34e   :  { %v2280_v23 = vadd.f32 %v2266_v19, %v2023_v14  ;;  %v2310_v59 = vadd.f32 %v5664_v27, %v5662_v12  ;;  %v2323_v24 = vmul.f32 %v5664_v27, %v5664_v27  ;;  %v5670_v22 = vadd.f32 %v2299_v0, %v2279_v17  ;;  %v4496_v14 = vld [vmem:[%s6096_s4 + $0xe4] ss:$8 sps:$4 sm:$0xff]   ;;  %v4499_v19 = vld [vmem:[%s6096_s4 + $0x1b4] ss:$8 sps:$4 sm:$0xff]  }
 0x34f   :  { %v2270_v25 = vpop.f32.mrf.mxu0  ;;  %v4604_v17 = vmov 5  }
 0x350   :  { %v5672_v39 = vadd.f32 %v2303_v7, %v2280_v23  ;;  %v2281_v28 = vadd.f32 %v2270_v25, %v2027_v57  ;;  %2311 = vadd.xlane.f32.xlu1 %v2310_v59  ;;  %v2328_v32 = vadd.f32 %v2323_v24, %v2322_v5  ;;  %v2324_v58 = vmul.f32 %v5670_v22, %v5670_v22  ;;  %v4497_v57 = vld [vmem:[%s6096_s4 + $0x1b0] ss:$8 sps:$4 sm:$0xff]   ;;  %v4502_v23 = vld [vmem:[%s6096_s4 + $0xd4] ss:$8 sps:$4 sm:$0xff]   ;;  %v4596_v24 = vld [vmem:[%s6090_s1 + $0x4] sm:$0xf] }
 0x351   :  { %v2272_v33 = vpop.f32.mrf.mxu0  ;;  %3039 = vmatpush2.bf16.msra.mxu0 %v4488_v11  ;;  %v4500_v59 = vld [vmem:[%s6096_s4 + $0xd0] ss:$8 sps:$4 sm:$0xff]   ;;  %v4508_v25 = vld [vmem:[%s6096_s4 + $0xc4] ss:$8 sps:$4 sm:$0xff]   ;;  %v4511_v5 = vld [vmem:[%s6096_s4 + $0x194] ss:$8 sps:$4 sm:$0xff]  }
 0x352   :  { %v2282_v29 = vadd.f32 %v2272_v33, %v2029_v16  ;;  %v2313_v6 = vadd.f32 %v5672_v39, %v5670_v22  ;;  %v2325_v34 = vmul.f32 %v5672_v39, %v5672_v39  ;;  %v5680_v31 = vadd.f32 %v2299_v0, %v2281_v28  ;;  %v4487_v0 = vld [vmem:[%s6096_s4 + $0x1d4] ss:$8 sps:$4 sm:$0xff]   ;;  %3040 = vmatprep.subr.bf16.mxu0 %v4496_v14  ;;  %v4503_v16 = vld [vmem:[%s6096_s4 + $0x1a0] ss:$8 sps:$4 sm:$0xff]   ;;  %v4509_v33 = vld [vmem:[%s6096_s4 + $0x190] ss:$8 sps:$4 sm:$0xff]  }
 0x353   :  { %v2274_v9 = vpop.f32.mrf.mxu0  ;;  %2831 = vmatprep.subr.bf16.mxu1 %v4487_v0  ;;  %v4506_v28 = vld [vmem:[%s6096_s4 + $0xc0] ss:$8 sps:$4 sm:$0xff]   ;;  %v2370_v14 = vrot.slane %v5654_v54, %v5418_v60 }
 0x354   :  { %v5682_v10 = vadd.f32 %v2303_v7, %v2282_v29  ;;  %2329 = vadd.xlane.f32.xlu1 %v2328_v32  ;;  %2314 = vadd.xlane.f32.xlu0 %v2313_v6  ;;  %v2331_v41 = vadd.f32 %v2325_v34, %v2324_v58  ;;  %v2326_v43 = vmul.f32 %v5680_v31, %v5680_v31  ;;  %v4485_v7 = vld [vmem:[%s6096_s4 + $0x1d0] ss:$8 sps:$4 sm:$0xff]   ;;  %v4514_v29 = vld [vmem:[%s6096_s4 + $0xb4] ss:$8 sps:$4 sm:$0xff]   ;;  %v4518_v6 = vld [vmem:[%s6096_s4 + $0xa0] ss:$8 sps:$4 sm:$0xff]  }
 0x355   :  { %v2275_v36 = vpop.f32.mrf.mxu0  ;;  %2832 = vmatpush2.bf16.msra.mxu1 %v4485_v7  ;;  %v4512_v32 = vld [vmem:[%s6096_s4 + $0xb0] ss:$8 sps:$4 sm:$0xff]   ;;  %v4520_v34 = vld [vmem:[%s6096_s4 + $0xa4] ss:$8 sps:$4 sm:$0xff]   ;;  %v4597_v9 = vld [vmem:[%s6090_s1 + $0x8] sm:$0xf] }
 0x356   :  { %v2316_v40 = vadd.f32 %v5682_v10, %v5680_v31  ;;  %v2327_v42 = vmul.f32 %v5682_v10, %v5682_v10  ;;  %2833 = vmatprep.subr.bf16.mxu1 %v4493_v38  ;;  %v4523_v58 = vld [vmem:[%s6096_s4 + $0x274] ss:$8 sps:$4 sm:$0xff]  }
 0x357   :  { %v4526_v36 = vld [vmem:[%s6096_s4 + $0x94] ss:$8 sps:$4 sm:$0xff]  }
 0x358   :  { %2332 = vadd.xlane.f32.xlu1 %v2331_v41  ;;  %2317 = vadd.xlane.f32.xlu0 %v2316_v40  ;;  %v2334_v45 = vadd.f32 %v2327_v42, %v2326_v43  ;;  %v4524_v41 = vld [vmem:[%s6096_s4 + $0x90] ss:$8 sps:$4 sm:$0xff]   ;;  %v4532_v40 = vld [vmem:[%s6096_s4 + $0x84] ss:$8 sps:$4 sm:$0xff]   ;;  %v4530_v42 = vld [vmem:[%s6096_s4 + $0x80] ss:$8 sps:$4 sm:$0xff]  }
 0x359   :  { %2834 = vmatpush2.bf16.msra.mxu1 %v4491_v13 }
 0x35a   :  { %2835 = vmatprep.subr.bf16.mxu1 %v4499_v19  ;;  %v2398_v19 = vrot.slane %v5654_v54, %v5427_v26 }
 0x35c   :  { %2335 = vadd.xlane.f32.xlu1 %v2334_v45 }
 0x35d   :  { %2836 = vmatpush2.bf16.msra.mxu1 %v4497_v57 }
 0x36d   :  { %2480 = vperm.xlu1 %4104, %v5323_v62   ;;  %v4494_v62 = vld [vmem:[%s6096_s4 + $0xe0] ss:$8 sps:$4 sm:$0xff]  }
 0x36e   :  { %2469 = vperm.xlu0 %4103, %v5344_v4   ;;  %3041 = vmatpush2.bf16.msra.mxu0 %v4494_v62  ;;  %v2374_v62 = vrot.slane %v5654_v54, %v5421_v61 }
 0x36f   :  { %3042 = vmatprep.subr.bf16.mxu0 %v4502_v23 }
 0x371   :  { %4105 = vset.pattern.permute.xlu1 %v4604_v17 }
 0x372   :  { %2540 = vperm.xlu1 %4105, %v5344_v4   ;;  %4108 = vset.pattern.permute.xlu0 %v4604_v17  ;;  %v4505_v4 = vld [vmem:[%s6096_s4 + $0x1a4] ss:$8 sps:$4 sm:$0xff]  }
 0x373   :  { %3043 = vmatpush2.bf16.msra.mxu0 %v4500_v59  ;;  %2837 = vmatprep.subr.bf16.mxu1 %v4505_v4  ;;  %v2380_v59 = vrot.slane %v2370_v14, %v5418_v60  ;;  %v2384_v4 = vrot.slane %v2374_v62, %v5418_v60 }
 0x374   :  { %2838 = vmatpush2.bf16.msra.mxu1 %v4503_v16  ;;  %3044 = vmatprep.subr.bf16.mxu0 %v4508_v25 }
 0x375   :  { %2839 = vmatprep.subr.bf16.mxu1 %v4511_v5 }
 0x376   :  { %2551 = vperm.xlu1 %4105, %v4596_v24  }
 0x377   :  { %3045 = vmatpush2.bf16.msra.mxu0 %v4506_v28 }
 0x378   :  { %2840 = vmatpush2.bf16.msra.mxu1 %v4509_v33  ;;  %3046 = vmatprep.subr.bf16.mxu0 %v4514_v29  ;;  %v2408_v33 = vrot.slane %v2398_v19, %v5424_v1  ;;  %v4527_v19 = vld [vmem:[%s6096_s4 + $0x260] ss:$8 sps:$4 sm:$0xff]  }
 0x37a   :  { %4106 = vset.pattern.permute.xlu1 %v4603_v18  ;;  %v4517_v18 = vld [vmem:[%s6096_s4 + $0x184] ss:$8 sps:$4 sm:$0xff]  }
 0x37b   :  { %2491 = vperm.xlu1 %4106, %v5380_v20   ;;  %3047 = vmatpush2.bf16.msra.mxu0 %v4512_v32  ;;  %v4515_v20 = vld [vmem:[%s6096_s4 + $0x180] ss:$8 sps:$4 sm:$0xff]  }
 0x37c   :  { %2841 = vmatprep.subr.bf16.mxu1 %v4517_v18  ;;  %3048 = vmatprep.subr.bf16.mxu0 %v4520_v34 }
 0x37d   :  { %2842 = vmatpush2.bf16.msra.mxu1 %v4515_v20 }
 0x37e   :  { %3266 = vmatprep.subr.bf16.mxu1 %v4523_v58 }
 0x37f   :  { %4107 = vset.pattern.permute.xlu1 %v4604_v17  ;;  %3049 = vmatpush2.bf16.msra.mxu0 %v4518_v6  ;;  %v2394_v17 = vrot.slane %v5654_v54, %v5424_v1 }
 0x380   :  { %2562 = vperm.xlu1 %4107, %v4597_v9   ;;  %3050 = vmatprep.subr.bf16.mxu0 %v4526_v36 }
 0x381   :  { %v2404_v5 = vrot.slane %v2394_v17, %v5424_v1 }
 0x383   :  { %3051 = vmatpush2.bf16.msra.mxu0 %v4524_v41 }
 0x384   :  { %3052 = vmatprep.subr.bf16.mxu0 %v4532_v40 }
 0x387   :  { %3053 = vmatpush2.bf16.msra.mxu0 %v4530_v42 }
 0x3d9   :  { %v2312_v43 = vpop.xlane.xlu1 %2311 }
 0x3da   :  { %v2319_v44 = vmul.f32 0.006666667, %v2312_v43 }
 0x3dc   :  { %v2340_v50 = vmul.f32 %v2319_v44, %v2319_v44  ;;  %v2349_v57 = vsub.f32 %v5662_v12, %v2319_v44  ;;  %v2350_v23 = vsub.f32 %v5664_v27, %v2319_v44 }
 0x3dd   :  { %v2315_v45 = vpop.xlane.xlu0 %2314  ;;  %v2330_v46 = vpop.xlane.xlu1 %2329 }
 0x3de   :  { %v2320_v49 = vmul.f32 0.006666667, %v2315_v45  ;;  %v2337_v15 = vmul.f32 0.006666667, %v2330_v46 }
 0x3e0   :  { %v2343_v48 = vsub.f32 %v2337_v15, %v2340_v50  ;;  %v2341_v21 = vmul.f32 %v2320_v49, %v2320_v49  ;;  %v2351_v29 = vsub.f32 %v5670_v22, %v2320_v49  ;;  %v2352_v54 = vsub.f32 %v5672_v39, %v2320_v49 }
 0x3e1   :  { %v2318_v30 = vpop.xlane.xlu0 %2317  ;;  %v2333_v51 = vpop.xlane.xlu1 %2332 }
 0x3e2   :  { %v2346_v52 = vmax.f32 %v2343_v48, 0.0  ;;  %v2321_v53 = vmul.f32 0.006666667, %v2318_v30  ;;  %v2338_v35 = vmul.f32 0.006666667, %v2333_v51 }
 0x3e4   :  { %v2355_v63 = vadd.f32 1e-05, %v2346_v52  ;;  %v2344_v37 = vsub.f32 %v2338_v35, %v2341_v21  ;;  %v2342_v0 = vmul.f32 %v2321_v53, %v2321_v53  ;;  %v2353_v58 = vsub.f32 %v5680_v31, %v2321_v53 }
 0x3e5   :  { %v2336_v2 = vpop.xlane.xlu1 %2335  ;;  %v2354_v36 = vsub.f32 %v5682_v10, %v2321_v53  ;;  %v4521_v53 = vld [vmem:[%s6096_s4 + $0x270] ss:$8 sps:$4 sm:$0xff]  }
 0x3e6   :  { %4581 = vrsqrt.f32 %v2355_v63  ;;  %v2347_v3 = vmax.f32 %v2344_v37, 0.0  ;;  %v2339_v7 = vmul.f32 0.006666667, %v2336_v2 }
 0x3e8   :  { %v2356_v8 = vadd.f32 1e-05, %v2347_v3  ;;  %v2345_v11 = vsub.f32 %v2339_v7, %v2342_v0  ;;  %v4529_v3 = vld [vmem:[%s6096_s4 + $0x264] ss:$8 sps:$4 sm:$0xff]  }
 0x3e9   :  { %v5850_v24 = vpop.permute.xlu1 %2480  ;;  %v2470_v52 = vpop.permute.xlu0 %2469 }
 0x3ea   :  { %4583 = vrsqrt.f32 %v2356_v8  ;;  %v2348_v38 = vmax.f32 %v2345_v11, 0.0  ;;  %v2489_v63 = vrot.slane %v5850_v24, %v4955_v47  ;;  %v2478_v37 = vrot.slane %v2470_v52, %v4955_v47  ;;  %v4541_v52 = vld [vmem:[%s6096_s4 + $0x234] ss:$8 sps:$4 sm:$0xff]  }
 0x3ec   :  { %v2357_v13 = vadd.f32 1e-05, %v2348_v38 }
 0x3ed   :  { %v5856_v18 = vpop.permute.xlu1 %2540 }
 0x3ee   :  { %4585 = vrsqrt.f32 %v2357_v13 }
 0x3f1   :  { %v5860_v48 = vpop.permute.xlu1 %2551 }
 0x3f3   :  { %v4582_v16 = vpop.eup %4581 }
 0x3f4   :  { %v2361_v25 = vmul.f32 %v4582_v16, %v2349_v57  ;;  %v2362_v28 = vmul.f32 %v4582_v16, %v2350_v23  ;;  %v3904_v23 = vcombine.low %v2478_v37, %v2489_v63  ;;  %v4535_v16 = vld [vmem:[%s6096_s4 + $0x254] ss:$8 sps:$4 sm:$0xff]   ;;  %v4539_v37 = vld [vmem:[%s6096_s4 + $0x230] ss:$8 sps:$4 sm:$0xff]   ;;  %v4556_v57 = vld [vmem:[%s6096_s4 + $0x2e4] ss:$8 sps:$4 sm:$0xff]  }
 0x3f6   :  { %v2385_v12 = vmul.f32 %v2380_v59, %v2361_v25  ;;  %v2386_v32 = vmul.f32 %v2384_v4, %v2362_v28  ;;  %v2492_v17 = vpop.permute.xlu1 %2491 }
 0x3f7   :  { %v4584_v27 = vpop.eup %4583  ;;  %v2500_v24 = vrot.slane %v2492_v17, %v4955_v47  ;;  %v4553_v17 = vld [vmem:[%s6096_s4 + $0x2f4] ss:$8 sps:$4 sm:$0xff]  }
 0x3f8   :  { %v2363_v20 = vmul.f32 %v4584_v27, %v2351_v29  ;;  %v2364_v6 = vmul.f32 %v4584_v27, %v2352_v54  ;;  %v2409_v34 = vadd.f32 %v2404_v5, %v2385_v12  ;;  %v2410_v9 = vadd.f32 %v2408_v33, %v2386_v32 }
 0x3f9   :  { %v2549_v27 = vrot.slane %v5856_v18, %v4955_v47  ;;  %v4538_v18 = vld [vmem:[%s6096_s4 + $0x244] ss:$8 sps:$4 sm:$0xff]  }
 0x3fa   :  { %v2387_v41 = vmul.f32 %v2380_v59, %v2363_v20  ;;  %v2388_v40 = vmul.f32 %v2384_v4, %v2364_v6  ;;  %v2415_v42 = vmax.f32 %v2409_v34, 0.0  ;;  %v2416_v43 = vmax.f32 %v2410_v9, 0.0  ;;  %v4533_v9 = vld [vmem:[%s6096_s4 + $0x250] ss:$8 sps:$4 sm:$0xff]  }
 0x3fb   :  { %v4586_v22 = vpop.eup %4585  ;;  %v2560_v20 = vrot.slane %v5860_v48, %v4955_v47  ;;  %v4536_v48 = vld [vmem:[%s6096_s4 + $0x240] ss:$8 sps:$4 sm:$0xff]  }
 0x3fc   :  { %v2365_v44 = vmul.f32 %v4586_v22, %v2353_v58  ;;  %v2366_v39 = vmul.f32 %v4586_v22, %v2354_v36  ;;  %v2411_v45 = vadd.f32 %v2404_v5, %v2387_v41  ;;  %v2412_v46 = vadd.f32 %v2408_v33, %v2388_v40 }
 0x3fd   :  { %v4081_v49 = vpack.c.bf16 %v2416_v43, %v2415_v42 }
 0x3fe   :  { %v2389_v50 = vmul.f32 %v2380_v59, %v2365_v44  ;;  %v2390_v15 = vmul.f32 %v2384_v4, %v2366_v39  ;;  %v2417_v30 = vmax.f32 %v2411_v45, 0.0  ;;  %v2418_v51 = vmax.f32 %v2412_v46, 0.0 }
 0x3ff   :  { %3496 = vst [vmem:[%s6097_s7] sm:$0xff] %v4081_v49  ;;  %v3905_v39 = vcombine.low %v2500_v24, %v2500_v24  ;;  %v5925_v49 = vcombine.low %v2549_v27, %v2560_v20  ;;  %v4557_v24 = vld [vmem:[%s6096_s4 + $0x2d0] ss:$8 sps:$4 sm:$0xff]  }
 0x400   :  { %v2422_v31 = vpack.c.bf16 %v2418_v51, %v2416_v43  ;;  %v4082_v10 = vpack.c.bf16 %v2418_v51, %v2417_v30  ;;  %v5868_v21 = vpack.c.bf16 %v2417_v30, %v2415_v42  ;;  %v2413_v35 = vadd.f32 %v2404_v5, %v2389_v50 }
 0x401   :  { %v2414_v2 = vadd.f32 %v2408_v33, %v2390_v15 }
 0x402   :  { %v2435_v0 = vshrl.u32 %v2422_v31, 16  ;;  %v2438_v7 = vshll.u32 %v2422_v31, 16  ;;  %2843 = vmatprep.mubr.bf16.mxu1 %v2422_v31  ;;  %3497 = vst [vmem:[%s6097_s7 + $0x8] sm:$0xff] %v4082_v10  ;;  %v2427_v8 = vshrl.u32 %v5868_v21, 16  ;;  %v2430_v11 = vshll.u32 %v5868_v21, 16 }
 0x403   :  { %2844 = vmatmul.mubr.bf16.vlgmr.msra.gmra.mxu1 %v5868_v21  ;;  %v2419_v38 = vmax.f32 %v2413_v35, 0.0  ;;  %v2420_v13 = vmax.f32 %v2414_v2, 0.0  ;;  %v4544_v2 = vld [vmem:[%s6096_s4 + $0x224] ss:$8 sps:$4 sm:$0xff]   ;;  %v4572_v21 = vld [vmem:[%s6096_s4 + $0x280] ss:$8 sps:$4 sm:$0xff]  }
 0x404   :  { %3267 = vmatpush1.bf16.msra.mxu1 %v4521_v53  ;;  %v2429_v14 = vrot.slane %v2427_v8, 6  ;;  %v2432_v62 = vrot.slane %v2430_v11, 7  ;;  %v2437_v28 = vrot.slane %v2435_v0, 6  ;;  %v2440_v5 = vrot.slane %v2438_v7, 7 }
 0x405   :  { %v5895_v59 = vpack.c.bf16 %v2419_v38, %v2419_v38  ;;  %v2424_v4 = vpack.c.bf16 %v2420_v13, %v2420_v13  ;;  %3268 = vmatprep.subr.bf16.mxu1 %v4529_v3  ;;  %v4083_v33 = vpack.c.bf16 %v2420_v13, %v2419_v38  ;;  %v2523_v58 = vrot.slane %v2435_v0, 1  ;;  %v4542_v0 = vld [vmem:[%s6096_s4 + $0x220] ss:$8 sps:$4 sm:$0xff]   ;;  %v4547_v38 = vld [vmem:[%s6096_s4 + $0x214] ss:$8 sps:$4 sm:$0xff]  }
 0x406   :  { %v2433_v25 = vor.u32 %v2432_v62, %v2429_v14  ;;  %v2441_v34 = vor.u32 %v2440_v5, %v2437_v28  ;;  %v2524_v36 = vrot.slane %v2438_v7, 2  ;;  %v4545_v13 = vld [vmem:[%s6096_s4 + $0x210] ss:$8 sps:$4 sm:$0xff]   ;;  %v4550_v14 = vld [vmem:[%s6096_s4 + $0x204] ss:$8 sps:$4 sm:$0xff]  }
 0x407   :  { %v2443_v29 = vshrl.u32 %v5895_v59, 16  ;;  %v2446_v54 = vshll.u32 %v5895_v59, 16  ;;  %v2452_v12 = vshrl.u32 %v2424_v4, 16  ;;  %v2455_v32 = vshll.u32 %v2424_v4, 16  ;;  %2853 = vmatprep.mubr.bf16.mxu1 %v2424_v4  ;;  %3498 = vst [vmem:[%s6097_s7 + $0x10] sm:$0xff] %v4083_v33 }
 0x408   :  { %v2466_v6 = vsel %vm5891_vm13, 0, %v2433_v25  ;;  %3269 = vmatpush1.bf16.msra.mxu1 %v4527_v19  ;;  %v2467_v46 = vsel %vm5891_vm13, 0, %v2441_v34  ;;  %v2525_v51 = vor.u32 %v2524_v36, %v2523_v58  ;;  %v4548_v62 = vld [vmem:[%s6096_s4 + $0x200] ss:$8 sps:$4 sm:$0xff]   ;;  %v4551_v19 = vld [vmem:[%s6096_s4 + $0x2f0] ss:$8 sps:$4 sm:$0xff]  }
 0x409   :  { %v2454_v41 = vrot.slane %v2452_v12, 6  ;;  %3270 = vmatprep.subr.bf16.mxu1 %v4535_v16  ;;  %v2445_v40 = vrot.slane %v2443_v29, 6  ;;  %v2448_v42 = vrot.slane %v2446_v54, 7  ;;  %v2457_v43 = vrot.slane %v2455_v32, 7  ;;  %v4559_v4 = vld [vmem:[%s6096_s4 + $0x2d4] ss:$8 sps:$4 sm:$0xff]  }
 0x40a   :  { %v2526_v22 = vrot.slane %v2452_v12, 1  ;;  %v2511_v44 = vmul.bf16 %v3904_v23, %v2466_v6  ;;  %v2527_v45 = vrot.slane %v2455_v32, 2  ;;  %v2512_v15 = vmul.bf16 %v3904_v23, %v2467_v46  ;;  %v4554_v23 = vld [vmem:[%s6096_s4 + $0x2e0] ss:$8 sps:$4 sm:$0xff]   ;;  %v4562_v16 = vld [vmem:[%s6096_s4 + $0x2c4] ss:$8 sps:$4 sm:$0xff]   ;;  %v2563_v6 = vpop.permute.xlu1 %2562 }
 0x40b   :  { %2854 = vmatmul.mubr.bf16.gmra.mxu1 %v5895_v59  ;;  %v2458_v50 = vor.u32 %v2457_v43, %v2454_v41  ;;  %v2449_v31 = vor.u32 %v2448_v42, %v2445_v40  ;;  %v4565_v28 = vld [vmem:[%s6096_s4 + $0x2b4] ss:$8 sps:$4 sm:$0xff]   ;;  %v4563_v5 = vld [vmem:[%s6096_s4 + $0x2b0] ss:$8 sps:$4 sm:$0xff]   ;;  %v4568_v33 = vld [vmem:[%s6096_s4 + $0x2a4] ss:$8 sps:$4 sm:$0xff]  }
 0x40c   :  { %3271 = vmatpush1.bf16.msra.mxu1 %v4533_v9  ;;  %v5930_v30 = vor.u32 %v2527_v45, %v2526_v22  ;;  %3054 = vmatprep.mubr.bf16.mxu0 %v2512_v15  ;;  %v4566_v12 = vld [vmem:[%s6096_s4 + $0x2a0] ss:$8 sps:$4 sm:$0xff]   ;;  %v4571_v32 = vld [vmem:[%s6096_s4 + $0x294] ss:$8 sps:$4 sm:$0xff]   ;;  %v2519_v27 = vrot.slane %v2443_v29, 1  ;;  %v2520_v20 = vrot.slane %v2446_v54, 2  ;;  %v2571_v54 = vrot.slane %v2563_v6, %v4955_v47 }
 0x40d   :  { %3272 = vmatprep.subr.bf16.mxu1 %v4538_v18  ;;  %v2459_v10 = vsel %vm2425_vm11, %v2441_v34, %v2458_v50  ;;  %3055 = vmatmul.mubr.bf16.vlgmr.msra.gmra.mxu0 %v2511_v44  ;;  %v2450_v3 = vsel %vm2425_vm11, %v2433_v25, %v2449_v31  ;;  %v4560_v25 = vld [vmem:[%s6096_s4 + $0x2c0] ss:$8 sps:$4 sm:$0xff]   ;;  %v2516_v34 = vrot.slane %v2427_v8, 1  ;;  %v2517_v9 = vrot.slane %v2430_v11, 2  ;;  %v4569_v58 = vld [vmem:[%s6096_s4 + $0x290] ss:$8 sps:$4 sm:$0xff]  }
 0x40e   :  { %v2514_v53 = vmul.bf16 %v3905_v39, %v2459_v10  ;;  %v2529_v35 = vsel %vm2515_vm14, %v2525_v51, %v5930_v30  ;;  %v2513_v7 = vmul.bf16 %v3905_v39, %v2450_v3  ;;  %v4574_v29 = vld [vmem:[%s6096_s4 + $0x284] ss:$8 sps:$4 sm:$0xff]   ;;  %v2521_v59 = vor.u32 %v2520_v20, %v2519_v27 }
 0x40f   :  { %v2583_v63 = vmul.bf16 %v5925_v49, %v2529_v35  ;;  %v2518_v8 = vor.u32 %v2517_v9, %v2516_v34  ;;  %v3907_v11 = vcombine.low %v2571_v54, %v2571_v54  ;;  %v2538_v41 = vsel %vm2536_vm0, %v5930_v30, 0  ;;  %v6025_v35 = vld [vmem:[%s6094_s5 + $0x10] sm:$0x77] }
 0x410   :  { %3273 = vmatpush1.bf16.msra.mxu1 %v4536_v48  ;;  %3064 = vmatprep.mubr.bf16.mxu0 %v2514_v53  ;;  %v2537_v47 = vsel %vm2536_vm0, %v2521_v59, 0 }
 0x411   :  { %3274 = vmatprep.subr.bf16.mxu1 %v4541_v52  ;;  %3298 = vmatprep.mubr.bf16.mxu1 %v2583_v63  ;;  %v2522_v36 = vsel %vm2515_vm14, %v2518_v8, %v2521_v59  ;;  %v2585_v40 = vmul.bf16 %v3907_v11, %v2538_v41  ;;  %v2584_v42 = vmul.bf16 %v3907_v11, %v2537_v47 }
 0x412   :  { %v2582_v18 = vmul.bf16 %v5925_v49, %v2522_v36  ;;  %v3329_v63 = vrot.slane %v6025_v35, %v5218_v55 }
 0x414   :  { %3275 = vmatpush1.bf16.msra.mxu1 %v4539_v37  ;;  %v3333_v37 = vrot.slane %v6025_v35, %v5221_v56  ;;  %v3339_v3 = vrot.slane %v3329_v63, %v5218_v55 }
 0x415   :  { %3276 = vmatprep.subr.bf16.mxu1 %v4544_v2  ;;  %3065 = vmatmul.mubr.bf16.gmra.mxu0 %v2513_v7 }
 0x418   :  { %3277 = vmatpush1.bf16.msra.mxu1 %v4542_v0 }
 0x419   :  { %3278 = vmatprep.subr.bf16.mxu1 %v4547_v38 }
 0x41c   :  { %3279 = vmatpush1.bf16.msra.mxu1 %v4545_v13  ;;  %v3343_v13 = vrot.slane %v3333_v37, %v5218_v55 }
 0x41d   :  { %3280 = vmatprep.subr.bf16.mxu1 %v4550_v14 }
 0x420   :  { %3281 = vmatpush1.bf16.msra.mxu1 %v4548_v62 }
 0x421   :  { %3282 = vmatprep.subr.bf16.mxu1 %v4553_v17 }
 0x424   :  { %3283 = vmatpush2.bf16.msra.mxu1 %v4551_v19 }
 0x425   :  { %3284 = vmatprep.subr.bf16.mxu1 %v4556_v57 }
 0x428   :  { %3285 = vmatpush2.bf16.msra.mxu1 %v4554_v23 }
 0x429   :  { %3286 = vmatprep.subr.bf16.mxu1 %v4559_v4 }
 0x42c   :  { %3287 = vmatpush2.bf16.msra.mxu1 %v4557_v24 }
 0x42d   :  { %3288 = vmatprep.subr.bf16.mxu1 %v4562_v16 }
 0x430   :  { %3289 = vmatpush2.bf16.msra.mxu1 %v4560_v25 }
 0x431   :  { %3290 = vmatprep.subr.bf16.mxu1 %v4565_v28 }
 0x434   :  { %3291 = vmatpush2.bf16.msra.mxu1 %v4563_v5 }
 0x435   :  { %3292 = vmatprep.subr.bf16.mxu1 %v4568_v33 }
 0x438   :  { %3293 = vmatpush2.bf16.msra.mxu1 %v4566_v12 }
 0x439   :  { %3294 = vmatprep.subr.bf16.mxu1 %v4571_v32 }
 0x43c   :  { %3295 = vmatpush2.bf16.msra.mxu1 %v4569_v58 }
 0x43d   :  { %3296 = vmatprep.subr.bf16.mxu1 %v4574_v29 }
 0x440   :  { %3297 = vmatpush2.bf16.msra.mxu1 %v4572_v21 }
 0x443   :  { %3299 = vmatmul.mubr.bf16.vlgmr.msra.gmra.mxu1 %v2582_v18 }
 0x444   :  { %3308 = vmatprep.mubr.bf16.mxu1 %v2585_v40 }
 0x44b   :  { %3309 = vmatmul.mubr.bf16.gmra.mxu1 %v2584_v42 }
 0x4c3   :  { %v2845_v43 = vpop.f32.mrf.mxu1 }
 0x4c5   :  { %v2847_v22 = vpop.f32.mrf.mxu1 }
 0x4c7   :  { %v2849_v44 = vpop.f32.mrf.mxu1 }
 0x4c9   :  { %v2851_v39 = vpop.f32.mrf.mxu1 }
 0x4cb   :  { %v2855_v45 = vpop.f32.mrf.mxu1 }
 0x4cd   :  { %v2857_v46 = vpop.f32.mrf.mxu1  ;;  %v3056_v50 = vpop.f32.mrf.mxu0 }
 0x4ce   :  { %v3057_v2 = vadd.f32 %v3056_v50, %v2845_v43 }
 0x4cf   :  { %v2859_v15 = vpop.f32.mrf.mxu1  ;;  %v3058_v48 = vpop.f32.mrf.mxu0 }
 0x4d0   :  { %v3059_v7 = vadd.f32 %v3058_v48, %v2847_v22 }
 0x4d1   :  { %v2860_v51 = vpop.f32.mrf.mxu1  ;;  %v3060_v30 = vpop.f32.mrf.mxu0 }
 0x4d2   :  { %v3061_v19 = vadd.f32 %v3060_v30, %v2849_v44 }
 0x4d3   :  { %v3062_v52 = vpop.f32.mrf.mxu0 }
 0x4d4   :  { %v3063_v23 = vadd.f32 %v3062_v52, %v2851_v39 }
 0x4d5   :  { %v3066_v31 = vpop.f32.mrf.mxu0 }
 0x4d6   :  { %v3067_v24 = vadd.f32 %v3066_v31, %v2855_v45 }
 0x4d7   :  { %v3068_v49 = vpop.f32.mrf.mxu0 }
 0x4d8   :  { %v3069_v12 = vadd.f32 %v3068_v49, %v2857_v46 }
 0x4d9   :  { %v3070_v10 = vpop.f32.mrf.mxu0 }
 0x4db   :  { %v3071_v53 = vpop.f32.mrf.mxu0 }
 0x503   :  { %v3300_v0 = vpop.f32.mrf.mxu1 }
 0x504   :  { %v3317_v38 = vadd.f32 %v3300_v0, %v3057_v2 }
 0x505   :  { %v3302_v14 = vpop.f32.mrf.mxu1 }
 0x506   :  { %v6033_v62 = vadd.f32 %v3339_v3, %v3317_v38  ;;  %v3318_v17 = vadd.f32 %v3302_v14, %v3059_v7  ;;  %v3410_v38 = vrot.slane %v6025_v35, %v5418_v60 }
 0x507   :  { %v3304_v57 = vpop.f32.mrf.mxu1 }
 0x508   :  { %v6035_v4 = vadd.f32 %v3343_v13, %v3318_v17  ;;  %v3319_v16 = vadd.f32 %v3304_v57, %v3061_v19  ;;  %v3362_v5 = vmul.f32 %v6033_v62, %v6033_v62  ;;  %v3434_v17 = vrot.slane %v6025_v35, %v5424_v1 }
 0x509   :  { %v3306_v56 = vpop.f32.mrf.mxu1  ;;  %v3438_v19 = vrot.slane %v6025_v35, %v5427_v26 }
 0x50a   :  { %v3320_v25 = vadd.f32 %v3306_v56, %v3063_v23  ;;  %v3350_v28 = vadd.f32 %v6035_v4, %v6033_v62  ;;  %v3363_v55 = vmul.f32 %v6035_v4, %v6035_v4  ;;  %v6045_v34 = vadd.f32 %v3339_v3, %v3319_v16 }
 0x50b   :  { %v3310_v33 = vpop.f32.mrf.mxu1 }
 0x50c   :  { %v6043_v32 = vadd.f32 %v3343_v13, %v3320_v25  ;;  %v3321_v27 = vadd.f32 %v3310_v33, %v3067_v24  ;;  %3351 = vadd.xlane.f32.xlu1 %v3350_v28  ;;  %v3368_v20 = vadd.f32 %v3363_v55, %v3362_v5  ;;  %v3364_v40 = vmul.f32 %v6045_v34, %v6045_v34 }
 0x50d   :  { %v3312_v6 = vpop.f32.mrf.mxu1  ;;  %v3420_v24 = vrot.slane %v3410_v38, %v5418_v60  ;;  %v3448_v25 = vrot.slane %v3438_v19, %v5424_v1 }
 0x50e   :  { %v6047_v9 = vadd.f32 %v3339_v3, %v3321_v27  ;;  %v3322_v58 = vadd.f32 %v3312_v6, %v3069_v12  ;;  %3369 = vadd.xlane.f32.xlu0 %v3368_v20  ;;  %v3353_v54 = vadd.f32 %v6043_v32, %v6045_v34  ;;  %v3365_v41 = vmul.f32 %v6043_v32, %v6043_v32 }
 0x50f   :  { %v3314_v29 = vpop.f32.mrf.mxu1 }
 0x510   :  { %v6049_v59 = vadd.f32 %v3343_v13, %v3322_v58  ;;  %v3366_v11 = vmul.f32 %v6047_v9, %v6047_v9  ;;  %v3371_v47 = vadd.f32 %v3365_v41, %v3364_v40  ;;  %v3414_v13 = vrot.slane %v6025_v35, %v5421_v61 }
 0x511   :  { %v3315_v8 = vpop.f32.mrf.mxu1  ;;  %v3444_v61 = vrot.slane %v3434_v17, %v5424_v1 }
 0x512   :  { %3354 = vadd.xlane.f32.xlu0 %v3353_v54  ;;  %v3356_v21 = vadd.f32 %v6049_v59, %v6047_v9  ;;  %v3367_v36 = vmul.f32 %v6049_v59, %v6049_v59  ;;  %v3424_v16 = vrot.slane %v3414_v13, %v5418_v60 }
 0x514   :  { %3357 = vadd.xlane.f32.xlu1 %v3356_v21  ;;  %v3374_v18 = vadd.f32 %v3367_v36, %v3366_v11 }
 0x516   :  { %3375 = vadd.xlane.f32.xlu0 %v3374_v18 }
 0x518   :  { %3372 = vadd.xlane.f32.xlu1 %v3371_v47 }
 0x595   :  { %v3352_v42 = vpop.xlane.xlu1 %3351 }
 0x596   :  { %v3359_v43 = vmul.f32 0.006666667, %v3352_v42 }
 0x597   :  { %v3370_v22 = vpop.xlane.xlu0 %3369 }
 0x598   :  { %v3377_v44 = vmul.f32 0.006666667, %v3370_v22  ;;  %v3380_v39 = vmul.f32 %v3359_v43, %v3359_v43  ;;  %v3389_v57 = vsub.f32 %v6033_v62, %v3359_v43  ;;  %v3390_v23 = vsub.f32 %v6035_v4, %v3359_v43 }
 0x59a   :  { %v3383_v45 = vsub.f32 %v3377_v44, %v3380_v39 }
 0x59b   :  { %v3355_v46 = vpop.xlane.xlu0 %3354 }
 0x59c   :  { %v3386_v50 = vmax.f32 %v3383_v45, 0.0  ;;  %v3360_v51 = vmul.f32 0.006666667, %v3355_v46 }
 0x59d   :  { %v3358_v15 = vpop.xlane.xlu1 %3357 }
 0x59e   :  { %v3395_v48 = vadd.f32 1e-05, %v3386_v50  ;;  %v3361_v30 = vmul.f32 0.006666667, %v3358_v15  ;;  %v3381_v53 = vmul.f32 %v3360_v51, %v3360_v51  ;;  %v3391_v60 = vsub.f32 %v6045_v34, %v3360_v51 }
 0x59f   :  { %v3376_v52 = vpop.xlane.xlu0 %3375  ;;  %v3392_v58 = vsub.f32 %v6043_v32, %v3360_v51 }
 0x5a0   :  { %4587 = vrsqrt.f32 %v3395_v48  ;;  %v3379_v31 = vmul.f32 0.006666667, %v3376_v52  ;;  %v3382_v49 = vmul.f32 %v3361_v30, %v3361_v30  ;;  %v3393_v62 = vsub.f32 %v6047_v9, %v3361_v30 }
 0x5a1   :  { %v3373_v10 = vpop.xlane.xlu1 %3372  ;;  %v3394_v4 = vsub.f32 %v6049_v59, %v3361_v30 }
 0x5a2   :  { %v3378_v63 = vmul.f32 0.006666667, %v3373_v10  ;;  %v3385_v37 = vsub.f32 %v3379_v31, %v3382_v49 }
 0x5a4   :  { %v3384_v2 = vsub.f32 %v3378_v63, %v3381_v53  ;;  %v3388_v3 = vmax.f32 %v3385_v37, 0.0 }
 0x5a6   :  { %v3387_v0 = vmax.f32 %v3384_v2, 0.0  ;;  %v3397_v7 = vadd.f32 1e-05, %v3388_v3 }
 0x5a8   :  { %v3396_v14 = vadd.f32 1e-05, %v3387_v0  ;;  %4589 = vrsqrt.f32 %v3397_v7 }
 0x5aa   :  { %4591 = vrsqrt.f32 %v3396_v14 }
 0x5ad   :  { %v4588_v56 = vpop.eup %4587 }
 0x5ae   :  { %v3401_v28 = vmul.f32 %v4588_v56, %v3389_v57  ;;  %v3402_v5 = vmul.f32 %v4588_v56, %v3390_v23 }
 0x5b0   :  { %v3425_v55 = vmul.f32 %v3420_v24, %v3401_v28  ;;  %v3426_v33 = vmul.f32 %v3424_v16, %v3402_v5 }
 0x5b2   :  { %v3449_v12 = vadd.f32 %v3444_v61, %v3425_v55  ;;  %v3450_v26 = vadd.f32 %v3448_v25, %v3426_v33 }
 0x5b4   :  { %v3455_v35 = vmax.f32 %v3449_v12, 0.0  ;;  %v3456_v27 = vmax.f32 %v3450_v26, 0.0 }
 0x5b5   :  { %v4590_v20 = vpop.eup %4589 }
 0x5b6   :  { %v4084_v6 = vpack.c.bf16 %v3456_v27, %v3455_v35  ;;  %v3405_v1 = vmul.f32 %v4590_v20, %v3393_v62  ;;  %v3406_v54 = vmul.f32 %v4590_v20, %v3394_v4 }
 0x5b7   :  { %v4592_v29 = vpop.eup %4591 }
 0x5b8   :  { %3515 = vst [vmem:[%s6098_s8] sm:$0xff] %v4084_v6  ;;  %v3403_v8 = vmul.f32 %v4592_v29, %v3391_v60  ;;  %v3404_v21 = vmul.f32 %v4592_v29, %v3392_v58  ;;  %v3429_v11 = vmul.f32 %v3420_v24, %v3405_v1  ;;  %v3430_v36 = vmul.f32 %v3424_v16, %v3406_v54 }
 0x5ba   :  { %v3427_v9 = vmul.f32 %v3420_v24, %v3403_v8  ;;  %v3428_v41 = vmul.f32 %v3424_v16, %v3404_v21  ;;  %v3453_v59 = vadd.f32 %v3444_v61, %v3429_v11  ;;  %v3454_v18 = vadd.f32 %v3448_v25, %v3430_v36 }
 0x5bc   :  { %v3451_v40 = vadd.f32 %v3444_v61, %v3427_v9  ;;  %v3452_v47 = vadd.f32 %v3448_v25, %v3428_v41  ;;  %v3459_v34 = vmax.f32 %v3453_v59, 0.0  ;;  %v3460_v42 = vmax.f32 %v3454_v18, 0.0 }
 0x5be   :  { %v3457_v32 = vmax.f32 %v3451_v40, 0.0  ;;  %v3458_v43 = vmax.f32 %v3452_v47, 0.0  ;;  %v4086_v22 = vpack.c.bf16 %v3460_v42, %v3459_v34 }
 0x5c0   :  { %v4085_v44 = vpack.c.bf16 %v3458_v43, %v3457_v32  ;;  %3517 = vst [vmem:[%s6098_s8 + $0x10] sm:$0xff] %v4086_v22 }
 0x5c2   :  { %3516 = vst [vmem:[%s6098_s8 + $0x8] sm:$0xff] %v4085_v44 }

</bundles_post_ra>
